<compile_context>
chip_gen: v5e
topology: v5e:2x2
jax: 0.10.0
libtpu: 0.0.40
codegen_flags: <defaults>
</compile_context>

<pallas_src>
import jax
import jax.numpy as jnp
from jax.experimental import pallas as pl
from jax.experimental.pallas import tpu as pltpu


def _vae_kernel(x_ref, eps_ref,
                w1_ref, b1_ref, w2_ref, b2_ref,
                w3_ref, b3_ref, w4_ref, b4_ref,
                recon_ref, enc_ref):
    cdt = w1_ref.dtype                      # MXU input dtype (bf16 by default)
    z_dim = eps_ref.shape[-1]

    x = x_ref[...].astype(cdt)              # already bf16 -> no-op cast
    eps = eps_ref[...].astype(jnp.float32)  # reparameterization math in f32

    # ----- encoder: Linear -> ReLU -> Linear  (MXU, f32 accumulation) -----
    h = jnp.dot(x, w1_ref[...], preferred_element_type=jnp.float32) + b1_ref[...]
    h = jnp.maximum(h, 0.0).astype(cdt)
    enc = jnp.dot(h, w2_ref[...], preferred_element_type=jnp.float32) + b2_ref[...]

    # ----- chunk + reparameterize: z = mu + exp(0.5*logvar) * eps  (f32 VPU/EUP) -----
    mu = enc[:, :z_dim]
    logvar = enc[:, z_dim:]
    z = mu + jnp.exp(0.5 * logvar) * eps

    # ----- decoder: Linear -> ReLU -> Linear -> Sigmoid -----
    hd = jnp.dot(z.astype(cdt), w3_ref[...], preferred_element_type=jnp.float32) + b3_ref[...]
    hd = jnp.maximum(hd, 0.0).astype(cdt)
    out = jnp.dot(hd, w4_ref[...], preferred_element_type=jnp.float32) + b4_ref[...]

    recon_ref[...] = jax.nn.sigmoid(out).astype(recon_ref.dtype)   # bf16 store (lane-dense)
    # Single lane-dense (tile_b, 2Z) f32 store (2Z=128 -> full unmasked vst);
    # mu/logvar are split outside the kernel with free XLA slices.
    enc_ref[...] = enc


def _tile_cap():
    """Generation-aware tile cap: v5e (1 TC, ~0.82 TB/s) prefers more, smaller steps."""
    try:
        kind = jax.devices()[0].device_kind.lower()
        if "v5 lite" in kind or "v5e" in kind:
            return 256
    except Exception:
        pass
    return 1024


def _pick_tile_b(B, *, min_steps=4):
    """Batch tile: >=128 rows feeds the MXU, and aim for >= min_steps grid steps so
    each v7x TensorCore gets >=2 pipelined (double-buffered) steps."""
    if B < 128:
        return max(16, ((B + 15) // 16) * 16)   # tiny batch: single step, bf16-sublane aligned
    tile = (B // min_steps) // 128 * 128
    return max(128, min(_tile_cap(), tile))


def prepare_params(params, matmul_dtype=jnp.bfloat16):
    """Cast weights to the MXU input dtype ONCE (biases stay f32). Cache and reuse the
    result across calls so no per-call convert ops precede the Pallas kernel."""
    out = dict(params)
    for k in ("w1", "w2", "w3", "w4"):
        out[k] = params[k].astype(matmul_dtype)
    return out


def vae_forward(x, eps, params, *, tile_b=None,
                matmul_dtype=jnp.bfloat16, recon_dtype=jnp.bfloat16):
    """Fused VAE forward.

    x:   (B, input_size) float32 (cast to bf16 before the kernel)
    eps: (B, z_dim)      float32 standard-normal noise (cast to bf16 before the kernel)
    params: w1 (D,H), b1 (1,H), w2 (H,2Z), b2 (1,2Z), w3 (Z,H), b3 (1,H),
            w4 (H,D), b4 (1,D); weights may be pre-cast via prepare_params.
    Returns (recon (B,D) bf16, mu (B,Z) f32, logvar (B,Z) f32).
    """
    B, D = x.shape
    Z = eps.shape[-1]
    H = params["w1"].shape[-1]

    if tile_b is None:
        tile_b = _pick_tile_b(B)
    assert tile_b % 8 == 0, f"tile_b must be a multiple of 8, got {tile_b}"

    # bf16 activation streams: halves the x/eps HBM bytes into the kernel.
    x = x.astype(matmul_dtype)
    eps = eps.astype(matmul_dtype)

    # Pad the batch so it divides the tile (sliced off after the call).
    Bp = ((B + tile_b - 1) // tile_b) * tile_b
    if Bp != B:
        pad = Bp - B
        x = jnp.pad(x, ((0, pad), (0, 0)))
        eps = jnp.pad(eps, ((0, pad), (0, 0)))

    grid = (Bp // tile_b,)

    # Weights through the MXU in bf16 (no-op if already pre-cast); biases stay f32.
    def as_mm(w):
        return w if w.dtype == matmul_dtype else w.astype(matmul_dtype)
    w1, w2, w3, w4 = (as_mm(params[k]) for k in ("w1", "w2", "w3", "w4"))
    b1, b2, b3, b4 = params["b1"], params["b2"], params["b3"], params["b4"]

    def batch_spec(cols):
        return pl.BlockSpec((tile_b, cols), lambda i: (i, 0))

    def full_spec(shape):
        # Constant-index weight/bias blocks: resident across the whole grid.
        return pl.BlockSpec(shape, lambda i: (0, 0))

    in_specs = [
        batch_spec(D),          # x tile (bf16)
        batch_spec(Z),          # eps tile (bf16)
        full_spec(w1.shape), full_spec(b1.shape),
        full_spec(w2.shape), full_spec(b2.shape),
        full_spec(w3.shape), full_spec(b3.shape),
        full_spec(w4.shape), full_spec(b4.shape),
    ]
    out_specs = [
        batch_spec(D),          # recon (bf16)
        batch_spec(2 * Z),      # enc = [mu | logvar]  (f32, lane-dense, 2Z=128)
    ]
    out_shape = (
        jax.ShapeDtypeStruct((Bp, D), recon_dtype),
        jax.ShapeDtypeStruct((Bp, 2 * Z), jnp.float32),
    )

    # Advisory cost hint for XLA's scheduler around this (small) custom call.
    weight_elems = D * H + H * 2 * Z + Z * H + H * D
    flops = 2 * Bp * weight_elems
    transcendentals = Bp * (Z + D)              # exp(0.5*logvar) + sigmoid(recon)
    bytes_accessed = (
        Bp * D * x.dtype.itemsize + Bp * Z * eps.dtype.itemsize          # x, eps in
        + weight_elems * jnp.dtype(matmul_dtype).itemsize                # bf16 weights
        + 4 * (2 * H + 2 * Z + D)                                        # f32 biases
        + Bp * D * jnp.dtype(recon_dtype).itemsize                       # recon out
        + Bp * 2 * Z * 4                                                 # enc out (f32)
    )

    recon, enc = pl.pallas_call(
        _vae_kernel,
        out_shape=out_shape,
        grid_spec=pltpu.PrefetchScalarGridSpec(
            num_scalar_prefetch=0,
            grid=grid,
            in_specs=in_specs,
            out_specs=out_specs,
        ),
        compiler_params=pltpu.CompilerParams(
            dimension_semantics=("parallel",)),   # batch tiles independent -> megacore
        cost_estimate=pl.CostEstimate(flops=flops,
                                      transcendentals=transcendentals,
                                      bytes_accessed=int(bytes_accessed)),
    )(x, eps, w1, b1, w2, b2, w3, b3, w4, b4)

    if Bp != B:
        recon = recon[:B]
        enc = enc[:B]
    mu = enc[:, :Z]
    logvar = enc[:, Z:]
    return recon, mu, logvar


def init_params(key, input_size, h_dim, z_dim):
    """PyTorch-Linear-style init (uniform +/- 1/sqrt(fan_in)); weights stored (in, out)."""
    def linear(k, fan_in, fan_out):
        kw, kb = jax.random.split(k)
        bound = 1.0 / jnp.sqrt(fan_in)
        w = jax.random.uniform(kw, (fan_in, fan_out), jnp.float32, -bound, bound)
        b = jax.random.uniform(kb, (1, fan_out), jnp.float32, -bound, bound)
        return w, b

    k1, k2, k3, k4 = jax.random.split(key, 4)
    w1, b1 = linear(k1, input_size, h_dim)        # encoder[0]
    w2, b2 = linear(k2, h_dim, 2 * z_dim)         # encoder[2]
    w3, b3 = linear(k3, z_dim, h_dim)             # decoder[0]
    w4, b4 = linear(k4, h_dim, input_size)        # decoder[2]
    return dict(w1=w1, b1=b1, w2=w2, b2=b2, w3=w3, b3=b3, w4=w4, b4=b4)


def vae_reference(x, eps, p, matmul_dtype=jnp.float32):
    """Pure-JAX reference. matmul_dtype=bf16 mirrors the kernel's bf16 activation/weight path."""
    def lin(a, w, b):
        return jnp.dot(a.astype(matmul_dtype), w.astype(matmul_dtype),
                       preferred_element_type=jnp.float32) + b.astype(jnp.float32)
    h = jnp.maximum(lin(x, p["w1"], p["b1"]), 0.0)
    enc = lin(h, p["w2"], p["b2"])
    z_dim = eps.shape[-1]
    mu, logvar = enc[:, :z_dim], enc[:, z_dim:]
    eps_c = eps.astype(matmul_dtype).astype(jnp.float32)
    z = mu + jnp.exp(0.5 * logvar) * eps_c
    hd = jnp.maximum(lin(z, p["w3"], p["b3"]), 0.0)
    recon = jax.nn.sigmoid(lin(hd, p["w4"], p["b4"]))
    return recon, mu, logvar


if __name__ == "__main__":
    # Small shapes consistent with the module; B=256 -> tile_b=128, grid=(2,)
    # (multi-step parallel grid, lane-dense D=256 and 2Z=128 outputs).
    B, INPUT_SIZE, H_DIM, Z_DIM = 256, 256, 128, 64

    key = jax.random.PRNGKey(0)
    k_params, k_x, k_eps = jax.random.split(key, 3)

    params_f32 = init_params(k_params, INPUT_SIZE, H_DIM, Z_DIM)
    params = prepare_params(params_f32)          # bf16 weights cached once, reused per call

    x = jax.random.uniform(k_x, (B, INPUT_SIZE), jnp.float32)       # input batch
    eps = jax.random.normal(k_eps, (B, Z_DIM), jnp.float32)         # torch.randn equivalent

    recon, mu, logvar = vae_forward(x, eps, params)
    jax.block_until_ready((recon, mu, logvar))

    assert recon.shape == (B, INPUT_SIZE) and recon.dtype == jnp.bfloat16
    assert mu.shape == (B, Z_DIM) and logvar.shape == (B, Z_DIM)
    recon_f32 = recon.astype(jnp.float32)

    # Check against a bf16-matmul-matched reference (tight) ...
    recon_b, mu_b, logvar_b = vae_reference(x, eps, params_f32, matmul_dtype=jnp.bfloat16)
    assert jnp.allclose(recon_f32, recon_b, atol=2e-2, rtol=2e-2)
    assert jnp.allclose(mu, mu_b, atol=2e-2, rtol=2e-2)
    assert jnp.allclose(logvar, logvar_b, atol=2e-2, rtol=2e-2)

    # ... and against the pure-f32 reference (looser sanity on the bf16 path).
    recon_r, mu_r, logvar_r = vae_reference(x, eps, params_f32, matmul_dtype=jnp.float32)
    assert jnp.allclose(recon_f32, recon_r, atol=6e-2, rtol=6e-2)
    assert jnp.allclose(mu, mu_r, atol=6e-2, rtol=6e-2)
    assert jnp.allclose(logvar, logvar_r, atol=6e-2, rtol=6e-2)

    print("KERNEL_OK")
</pallas_src>

<mosaic_0001>
module attributes {stable_mosaic.version = 11 : i64} {
  func.func @_vae_kernel(%arg0: i32, %arg1: memref<128x256xbf16, #tpu.memory_space<vmem>>, %arg2: memref<128x64xbf16, #tpu.memory_space<vmem>>, %arg3: memref<256x128xbf16, #tpu.memory_space<vmem>>, %arg4: memref<1x128xf32, #tpu.memory_space<vmem>>, %arg5: memref<128x128xbf16, #tpu.memory_space<vmem>>, %arg6: memref<1x128xf32, #tpu.memory_space<vmem>>, %arg7: memref<64x128xbf16, #tpu.memory_space<vmem>>, %arg8: memref<1x128xf32, #tpu.memory_space<vmem>>, %arg9: memref<128x256xbf16, #tpu.memory_space<vmem>>, %arg10: memref<1x256xf32, #tpu.memory_space<vmem>>, %arg11: memref<128x256xbf16, #tpu.memory_space<vmem>>, %arg12: memref<128x128xf32, #tpu.memory_space<vmem>>) attributes {dimension_semantics = [#tpu.dimension_semantics<parallel>], iteration_bounds = array<i64: 2>, scalar_prefetch = 0 : i64, scratch_operands = 0 : i64, tpu.core_type = #tpu.core_type<tc>, window_params = [{transform_indices = @transform_0, window_bounds = array<i64: 128, 256>}, {transform_indices = @transform_1, window_bounds = array<i64: 128, 64>}, {pipeline_mode = #tpu.pipeline_mode<synchronous>, transform_indices = @transform_2, window_bounds = array<i64: 256, 128>}, {pipeline_mode = #tpu.pipeline_mode<synchronous>, transform_indices = @transform_3, window_bounds = array<i64: 1, 128>}, {pipeline_mode = #tpu.pipeline_mode<synchronous>, transform_indices = @transform_4, window_bounds = array<i64: 128, 128>}, {pipeline_mode = #tpu.pipeline_mode<synchronous>, transform_indices = @transform_5, window_bounds = array<i64: 1, 128>}, {pipeline_mode = #tpu.pipeline_mode<synchronous>, transform_indices = @transform_6, window_bounds = array<i64: 64, 128>}, {pipeline_mode = #tpu.pipeline_mode<synchronous>, transform_indices = @transform_7, window_bounds = array<i64: 1, 128>}, {pipeline_mode = #tpu.pipeline_mode<synchronous>, transform_indices = @transform_8, window_bounds = array<i64: 128, 256>}, {pipeline_mode = #tpu.pipeline_mode<synchronous>, transform_indices = @transform_9, window_bounds = array<i64: 1, 256>}, {transform_indices = @transform_10, window_bounds = array<i64: 128, 256>}, {transform_indices = @transform_11, window_bounds = array<i64: 128, 128>}]} {
    %c0 = arith.constant 0 : index
    %c0_0 = arith.constant 0 : index
    %0 = vector.load %arg1[%c0, %c0_0] : memref<128x256xbf16, #tpu.memory_space<vmem>>, vector<128x256xbf16>
    %c0_1 = arith.constant 0 : index
    %c0_2 = arith.constant 0 : index
    %1 = vector.load %arg2[%c0_1, %c0_2] : memref<128x64xbf16, #tpu.memory_space<vmem>>, vector<128x64xbf16>
    %2 = arith.extf %1 : vector<128x64xbf16> to vector<128x64xf32>
    %c0_3 = arith.constant 0 : index
    %c0_4 = arith.constant 0 : index
    %3 = vector.load %arg3[%c0_3, %c0_4] : memref<256x128xbf16, #tpu.memory_space<vmem>>, vector<256x128xbf16>
    %cst = arith.constant dense<0.000000e+00> : vector<128x128xf32>
    %4 = tpu.matmul %0, %3, %cst {dimension_numbers = #tpu.dot_dimension_numbers<[1], [0], [0], [1], [0, 0, 1, 1], [], []>} : vector<128x256xbf16>, vector<256x128xbf16>, vector<128x128xf32> -> vector<128x128xf32>
    %c0_5 = arith.constant 0 : index
    %c0_6 = arith.constant 0 : index
    %5 = vector.load %arg4[%c0_5, %c0_6] : memref<1x128xf32, #tpu.memory_space<vmem>>, vector<1x128xf32>
    %6 = vector.broadcast %5 : vector<1x128xf32> to vector<128x128xf32>
    %7 = arith.addf %4, %6 : vector<128x128xf32>
    %cst_7 = arith.constant 0.000000e+00 : f32
    %8 = vector.broadcast %cst_7 : f32 to vector<128x128xf32>
    %9 = arith.maximumf %7, %8 : vector<128x128xf32>
    %10 = arith.truncf %9 : vector<128x128xf32> to vector<128x128xbf16>
    %c0_8 = arith.constant 0 : index
    %c0_9 = arith.constant 0 : index
    %11 = vector.load %arg5[%c0_8, %c0_9] : memref<128x128xbf16, #tpu.memory_space<vmem>>, vector<128x128xbf16>
    %cst_10 = arith.constant dense<0.000000e+00> : vector<128x128xf32>
    %12 = tpu.matmul %10, %11, %cst_10 {dimension_numbers = #tpu.dot_dimension_numbers<[1], [0], [0], [1], [0, 0, 1, 1], [], []>} : vector<128x128xbf16>, vector<128x128xbf16>, vector<128x128xf32> -> vector<128x128xf32>
    %c0_11 = arith.constant 0 : index
    %c0_12 = arith.constant 0 : index
    %13 = vector.load %arg6[%c0_11, %c0_12] : memref<1x128xf32, #tpu.memory_space<vmem>>, vector<1x128xf32>
    %14 = vector.broadcast %13 : vector<1x128xf32> to vector<128x128xf32>
    %15 = arith.addf %12, %14 : vector<128x128xf32>
    %16 = vector.extract_strided_slice %15 {offsets = [0, 0], sizes = [128, 64], strides = [1, 1]} : vector<128x128xf32> to vector<128x64xf32>
    %17 = vector.extract_strided_slice %15 {offsets = [0, 64], sizes = [128, 64], strides = [1, 1]} : vector<128x128xf32> to vector<128x64xf32>
    %cst_13 = arith.constant 5.000000e-01 : f32
    %18 = vector.broadcast %cst_13 : f32 to vector<128x64xf32>
    %19 = arith.mulf %18, %17 : vector<128x64xf32>
    %20 = math.exp %19 : vector<128x64xf32>
    %21 = arith.mulf %20, %2 : vector<128x64xf32>
    %22 = arith.addf %16, %21 : vector<128x64xf32>
    %23 = arith.truncf %22 : vector<128x64xf32> to vector<128x64xbf16>
    %c0_14 = arith.constant 0 : index
    %c0_15 = arith.constant 0 : index
    %24 = vector.load %arg7[%c0_14, %c0_15] : memref<64x128xbf16, #tpu.memory_space<vmem>>, vector<64x128xbf16>
    %cst_16 = arith.constant dense<0.000000e+00> : vector<128x128xf32>
    %25 = tpu.matmul %23, %24, %cst_16 {dimension_numbers = #tpu.dot_dimension_numbers<[1], [0], [0], [1], [0, 0, 1, 1], [], []>} : vector<128x64xbf16>, vector<64x128xbf16>, vector<128x128xf32> -> vector<128x128xf32>
    %c0_17 = arith.constant 0 : index
    %c0_18 = arith.constant 0 : index
    %26 = vector.load %arg8[%c0_17, %c0_18] : memref<1x128xf32, #tpu.memory_space<vmem>>, vector<1x128xf32>
    %27 = vector.broadcast %26 : vector<1x128xf32> to vector<128x128xf32>
    %28 = arith.addf %25, %27 : vector<128x128xf32>
    %cst_19 = arith.constant 0.000000e+00 : f32
    %29 = vector.broadcast %cst_19 : f32 to vector<128x128xf32>
    %30 = arith.maximumf %28, %29 : vector<128x128xf32>
    %31 = arith.truncf %30 : vector<128x128xf32> to vector<128x128xbf16>
    %c0_20 = arith.constant 0 : index
    %c0_21 = arith.constant 0 : index
    %32 = vector.load %arg9[%c0_20, %c0_21] : memref<128x256xbf16, #tpu.memory_space<vmem>>, vector<128x256xbf16>
    %cst_22 = arith.constant dense<0.000000e+00> : vector<128x256xf32>
    %33 = tpu.matmul %31, %32, %cst_22 {dimension_numbers = #tpu.dot_dimension_numbers<[1], [0], [0], [1], [0, 0, 1, 1], [], []>} : vector<128x128xbf16>, vector<128x256xbf16>, vector<128x256xf32> -> vector<128x256xf32>
    %c0_23 = arith.constant 0 : index
    %c0_24 = arith.constant 0 : index
    %34 = vector.load %arg10[%c0_23, %c0_24] : memref<1x256xf32, #tpu.memory_space<vmem>>, vector<1x256xf32>
    %35 = vector.broadcast %34 : vector<1x256xf32> to vector<128x256xf32>
    %36 = arith.addf %33, %35 : vector<128x256xf32>
    %37 = arith.negf %36 : vector<128x256xf32>
    %38 = math.exp %37 : vector<128x256xf32>
    %cst_25 = arith.constant 1.000000e+00 : f32
    %39 = vector.broadcast %cst_25 : f32 to vector<128x256xf32>
    %40 = arith.addf %39, %38 : vector<128x256xf32>
    %41 = arith.divf %39, %40 : vector<128x256xf32>
    %42 = arith.truncf %41 : vector<128x256xf32> to vector<128x256xbf16>
    %c0_26 = arith.constant 0 : index
    %c0_27 = arith.constant 0 : index
    %43 = vector.load %arg11[%c0_26, %c0_27] : memref<128x256xbf16, #tpu.memory_space<vmem>>, vector<128x256xbf16>
    tpu.vector_store %arg11[%c0_26, %c0_27], %42 {strides = array<i32>} : memref<128x256xbf16, #tpu.memory_space<vmem>>, vector<128x256xbf16>,
    %c0_28 = arith.constant 0 : index
    %c0_29 = arith.constant 0 : index
    %44 = vector.load %arg12[%c0_28, %c0_29] : memref<128x128xf32, #tpu.memory_space<vmem>>, vector<128x128xf32>
    tpu.vector_store %arg12[%c0_28, %c0_29], %15 {strides = array<i32>} : memref<128x128xf32, #tpu.memory_space<vmem>>, vector<128x128xf32>,
    return
  }
  func.func @transform_0(%arg0: i32) -> (i32, i32) {
    %c0_i32 = arith.constant 0 : i32
    %c0_i32_0 = arith.constant 0 : i32
    return %arg0, %c0_i32 : i32, i32
  }
  func.func @transform_1(%arg0: i32) -> (i32, i32) {
    %c0_i32 = arith.constant 0 : i32
    %c0_i32_0 = arith.constant 0 : i32
    return %arg0, %c0_i32 : i32, i32
  }
  func.func @transform_2(%arg0: i32) -> (i32, i32) {
    %c0_i32 = arith.constant 0 : i32
    %c0_i32_0 = arith.constant 0 : i32
    %c0_i32_1 = arith.constant 0 : i32
    return %c0_i32, %c0_i32_0 : i32, i32
  }
  func.func @transform_3(%arg0: i32) -> (i32, i32) {
    %c0_i32 = arith.constant 0 : i32
    %c0_i32_0 = arith.constant 0 : i32
    %c0_i32_1 = arith.constant 0 : i32
    return %c0_i32, %c0_i32_0 : i32, i32
  }
  func.func @transform_4(%arg0: i32) -> (i32, i32) {
    %c0_i32 = arith.constant 0 : i32
    %c0_i32_0 = arith.constant 0 : i32
    %c0_i32_1 = arith.constant 0 : i32
    return %c0_i32, %c0_i32_0 : i32, i32
  }
  func.func @transform_5(%arg0: i32) -> (i32, i32) {
    %c0_i32 = arith.constant 0 : i32
    %c0_i32_0 = arith.constant 0 : i32
    %c0_i32_1 = arith.constant 0 : i32
    return %c0_i32, %c0_i32_0 : i32, i32
  }
  func.func @transform_6(%arg0: i32) -> (i32, i32) {
    %c0_i32 = arith.constant 0 : i32
    %c0_i32_0 = arith.constant 0 : i32
    %c0_i32_1 = arith.constant 0 : i32
    return %c0_i32, %c0_i32_0 : i32, i32
  }
  func.func @transform_7(%arg0: i32) -> (i32, i32) {
    %c0_i32 = arith.constant 0 : i32
    %c0_i32_0 = arith.constant 0 : i32
    %c0_i32_1 = arith.constant 0 : i32
    return %c0_i32, %c0_i32_0 : i32, i32
  }
  func.func @transform_8(%arg0: i32) -> (i32, i32) {
    %c0_i32 = arith.constant 0 : i32
    %c0_i32_0 = arith.constant 0 : i32
    %c0_i32_1 = arith.constant 0 : i32
    return %c0_i32, %c0_i32_0 : i32, i32
  }
  func.func @transform_9(%arg0: i32) -> (i32, i32) {
    %c0_i32 = arith.constant 0 : i32
    %c0_i32_0 = arith.constant 0 : i32
    %c0_i32_1 = arith.constant 0 : i32
    return %c0_i32, %c0_i32_0 : i32, i32
  }
  func.func @transform_10(%arg0: i32) -> (i32, i32) {
    %c0_i32 = arith.constant 0 : i32
    %c0_i32_0 = arith.constant 0 : i32
    return %arg0, %c0_i32 : i32, i32
  }
  func.func @transform_11(%arg0: i32) -> (i32, i32) {
    %c0_i32 = arith.constant 0 : i32
    %c0_i32_0 = arith.constant 0 : i32
    return %arg0, %c0_i32 : i32, i32
  }
}

</mosaic_0001>

<bundles_post_ra>
// kernel: tpu_custom_call.1
= control target key start
LH: loop header
LB: loop body
LE: loop exit
PB: predicated region body
PF: predicated region fallthrough
CT: control target
= control target key end

     0   :  { %s4567_s0 = inlined_call_operand.hbm [shape: bf16[256,256], index: 0, kind: input, shape index: {}]   ;;  %s4568_s1 = inlined_call_operand.vmem [shape: bf16[256,64], index: 1, kind: input, shape index: {}]   ;;  %s4569_s2 = inlined_call_operand.vmem [shape: bf16[256,128], index: 2, kind: input, shape index: {}]   ;;  %s4570_s3 = inlined_call_operand.hbm [shape: f32[1,128], index: 3, kind: input, shape index: {}]   ;;  %s4571_s4 = inlined_call_operand.vmem [shape: bf16[128,128], index: 4, kind: input, shape index: {}]   ;;  %s4572_s5 = inlined_call_operand.hbm [shape: f32[1,128], index: 5, kind: input, shape index: {}]   ;;  %s4573_s6 = inlined_call_operand.hbm [shape: bf16[64,128], index: 6, kind: input, shape index: {}]   ;;  %s4574_s7 = inlined_call_operand.vmem [shape: f32[1,128], index: 7, kind: input, shape index: {}]   ;;  %s4575_s8 = inlined_call_operand.hbm [shape: bf16[128,256], index: 8, kind: input, shape index: {}]   ;;  %s4576_s9 = inlined_call_operand.vmem [shape: f32[1,256], index: 9, kind: input, shape index: {}]   ;;  %s4577_s10 = inlined_call_operand.hbm [shape: bf16[256,256], index: 10, kind: output, shape index: {0}]   ;;  %s4578_s11 = inlined_call_operand.hbm [shape: f32[256,128], index: 11, kind: output, shape index: {1}]  }
   0x1   :  { %4581 = sst [smem:[#allocation20_spill]] %s4570_s3 }
   0x2   :  { %4582 = sst [smem:[#allocation21_spill]] %s4572_s5 }
   0x3   :  { %4583 = sst [smem:[#allocation22_spill]] %s4573_s6 }
   0x4   :  { %4584 = sst [smem:[#allocation23_spill]] %s4575_s8 }
   0x5   :  { %17 = vsyncpa [#allocation3], 0 }
   0x6   :  { %19 = vsyncpa [#allocation3 + $0x1], 0 }
   0x7   :  { %20 = vsyncpa [#allocation6], 0 }
   0x8   :  { %21 = vsyncpa [#allocation9], 0 }
   0x9   :  { %22 = vsyncpa [#allocation4], 0 }
   0xa   :  { %24 = vsyncpa [#allocation4 + $0x1], 0 }
   0xb   :  { %25 = vsyncpa [#allocation13], 0 }
   0xc   :  { %27 = vsyncpa [#allocation13 + $0x1], 0  ;;  %s3464_s17 = smov 0   ;;  %s3466_s18 = smov 0  }
   0xd   :  { %s3468_s19 = smov 0   ;;  %s3470_s20 = smov 0  }
   0xe LB: > { %s3485_s21 = sadd.s32 4294967295, %s3391_s20   ;;  %s2407_s22 = sadd.s32 4294967294, %s3391_s20   ;;  %s3391_s20 = sphi %s3470_s20, %s4659_s20   ;;  %s3387_s19 = sphi %s3468_s19, %s4658_s19   ;;  %s3383_s18 = sphi %s3466_s18, %s4657_s18   ;;  %s3379_s17 = sphi %s3464_s17, %s4656_s17  }
   0xf   : > { %p53_p0 = scmp.ne.s32.totalorder %s3383_s18, %s3379_s17  ;;  %p54_p1 = scmp.eq.s32.totalorder %s3485_s21, 0 }
  0x10   : > { %p271_p2 = scmp.eq.s32.totalorder %s3485_s21, 1  ;;  %p277_p3 = scmp.eq.s32.totalorder %s2407_s22, 1 }
  0x11   : > { %p3494_p4 = por %p54_p1, %p53_p0  ;;  %p2408_p5 = scmp.ge.s32.totalorder %s3391_s20, 1 }
  0x12   : > { %p3499_p6 = por %p277_p3, %p53_p0  ;;  %p310_p7 = scmp.lt.s32.totalorder %s3391_s20, 3 }
  0x13   : > { %s4587_s3 = sld [smem:[#allocation20_spill]]  ;;  %s3393_s29 = smov [#allocation5]  }
  0x14   : > { %p3507_p8 = pnand %p2408_p5, %p310_p7  ;;  %s327_s30 = sshll.u32 %s3393_s29, 4  ;;  %s328_s30 = int_to_ptr.vmem [resolvable:$true] %s327_s30 }
  0x15   : > { %s4589_s6 = sld [smem:[#allocation22_spill]]  ;;  %s3394_s16 = smov [#allocation8]  }
  0x16   : > { %p2855_p10 = pneg %p3507_p8  ;;  %s353_s22 = sshll.u32 %s3394_s16, 4  ;;  %s354_s22 = int_to_ptr.vmem [resolvable:$true] %s353_s22 }
  0x17   : > { %s3395_s25 = smov 64   ;;  %s3396_s26 = smov 4  }
  0x18   : > { %p3519_p11 = pnand %p2855_p10, %p54_p1  ;;  %s4591_s5 = sld [smem:[#allocation21_spill]] }
  0x19   : > { %s325_s27 = sshll.u32 %s4587_s3, 4  ;;  %s3397_s3 = smov [#allocation7]   ;;  %s326_s27 = int_to_ptr.hbm [resolvable:$true] %s325_s27 }
  0x1a   : > { %2858 = dma.hbm_to_vmem [thread:$0]  (!%p3519_p11), %s326_s27, 16, %s328_s30, [#allocation6]  }
  0x1b   : > { %s351_s14 = sshll.u32 %s4589_s6, 4  ;;  %s342_s16 = sshll.u32 %s3397_s3, 4  ;;  %s352_s14 = int_to_ptr.hbm [resolvable:$true] %s351_s14  ;;  %s343_s16 = int_to_ptr.vmem [resolvable:$true] %s342_s16 }
  0x1c   : > { %2864 = dma.hbm_to_vmem [thread:$0]  (!%p3519_p11), %s352_s14, 512, %s354_s22, [#allocation9], %s3395_s25, %s3395_s25, %s3396_s26  }
  0x1d   : > { %s4592_s8 = sld [smem:[#allocation23_spill]]  ;;  %s3398_s14 = smov [#allocation10]  }
  0x1e   : > { %s340_s13 = sshll.u32 %s4591_s5, 4  ;;  %s370_s22 = sshll.u32 %s3398_s14, 4  ;;  %s341_s13 = int_to_ptr.hbm [resolvable:$true] %s340_s13  ;;  %s371_s22 = int_to_ptr.vmem [resolvable:$true] %s370_s22 }
  0x1f   : > { %2861 = dma.hbm_to_vmem [thread:$0]  (!%p3519_p11), %s341_s13, 16, %s343_s16, [#allocation6]  }
  0x20   : > { %s4579_s25 = smov 128   ;;  %s4580_s26 = smov 8  }
  0x21   : > { %s3541_s3 = sadd.s32 1, %s3391_s20   ;;  %s40_s12 = sadd.s32 1, %s3387_s19 }
  0x22   : > { %s37_s29 = ssub.s32 %s3391_s20, %s3541_s3  ;;  %p47_p13 = scmp.ne.s32.totalorder %s3387_s19, %s3383_s18 }
  0x23   : > { %s368_s6 = sshll.u32 %s4592_s8, 4  ;;  %p38_p12 = scmp.eq.s32.totalorder %s37_s29, 0  ;;  %s369_s6 = int_to_ptr.hbm [resolvable:$true] %s368_s6 }
  0x24   : > { %2867 = dma.hbm_to_vmem [thread:$0]  (!%p3519_p11), %s369_s6, 2048, %s371_s22, [#allocation9], %s4579_s25, %s4579_s25, %s4580_s26  }
  0x25   : > { %p48_p0 = scmp.eq.s32.totalorder %s3391_s20, 0  ;;  %p3554_p5 = por %p271_p2, %p47_p13 }
  0x26   : > { %s3550_s13 = scalar_select %p38_p12, %s3387_s19, %s40_s12  }
  0x27   : > { %p49_p3 = por %p48_p0, %p47_p13  ;;  %p2883_p7 = scmp.lt.s32.totalorder %s3391_s20, 2 }
  0x28   : > { %4593 = sst [smem:[#allocation19_spill]] %s3550_s13  ;;  %s387_s15 = sand.u32 1, %s3387_s19  }
  0x29   : > { %s2414_s27 = sshll.u32 %s387_s15, 7  ;;  %s2718_s6 = sshll.u32 %s3391_s20, 7 }
  0x2a   : > { %s397_s22 = scalar_lea.hbm %s4567_s0, %s2718_s6  ;;  %s391_s29 = scalar_lea.vmem [#allocation2], %s2414_s27 }
  0x2b   : > { %s400_s25 = sshll.u32 %s391_s29, 4  ;;  %s398_s26 = sshll.u32 %s397_s22, 4  ;;  %s401_s25 = int_to_ptr.vmem [resolvable:$true] %s400_s25  ;;  %s399_s26 = int_to_ptr.hbm [resolvable:$true] %s398_s26 }
  0x2c   : > { %p3564_p10 = pnand %p2883_p7, %p49_p3  ;;  %s388_s5 = scalar_lea.sflag [#allocation3], %s387_s15 }
  0x2d   : > { %s3255_s8 = sshra.s32 %s399_s26, 4  ;;  %s3262_s30 = scalar_lea.hbm %s4567_s0, 256  ;;  %s3256_s8 = int_to_ptr.hbm [resolvable:$true] %s3255_s8 }
  0x2e   : > { %s3257_s13 = scalar_lea.hbm %s3256_s8, 128  ;;  %p3259_p11 = pneg %p3564_p10 }
  0x2f   : > { %p3258_p2 = scmp.ne.s32.totalorder %s3256_s8, %s3257_s13  ;;  %p3263_p0 = scmp.lt.s32.totalorder %s3256_s8, %s4567_s0 }
  0x30   : > { %p3264_p3 = scmp.lt.s32.totalorder %s3262_s30, %s3257_s13 }
  0x31   : > { %p3260_p12 = pnand %p3259_p11, %p3258_p2 }
  0x32   : > { %p3265_p7 = por %p3264_p3, %p3263_p0 }
  0x33   : > { %p3261_p13 = pneg %p3260_p12 }
  0x35   : > { %p3266_p9 = pnand %p3265_p7, %p3261_p13 }
  0x37   : > { %3269 = shalt.err (!%p3266_p9)
}
  0x38   : > { %s4596_s15 = smov 8   ;;  %s4597_s29 = smov 128  }
  0x39   : > { %2871 = dma.hbm_to_vmem [thread:$0]  (!%p3564_p10), %s399_s26, 2048, %s401_s25, %s388_s5, %s4597_s29, %s4597_s29, %s4596_s15  }
  0x3a   : > { %421 = sbr.rel (%p3507_p8) target bundleno = 1066 (0x42a), region = 60  ;;  %s3584_s6 = sand.u32 (!%p3507_p8), 1, %s3383_s18  }
  0x3b   : > { %s3587_s8 = sshll.u32 (!%p3507_p8), %s3584_s6, 7  ;;  %s424_s13 = scalar_lea.sflag (!%p3507_p8), [#allocation3], %s3584_s6 }
  0x3c   : > { %s3591_s27 = scalar_lea.vmem (!%p3507_p8), [#allocation2], %s3587_s8 }
  0x3f   : > { %3358 = dma.done.wait (%p3494_p4), %s424_s13, 2048  }
  0x40   : > { %3360 = vsyncadd (%p3494_p4), %s424_s13, 4294965248 }
  0x41   : > { %3362 = dma.done.wait (%p54_p1), [#allocation6], 32  }
  0x42   : > { %3364 = vsyncadd (%p54_p1), [#allocation6], 4294967264 }
  0x43   : > { %3366 = dma.done.wait (%p54_p1), [#allocation9], 2560  }
  0x44   : > { %3368 = vsyncadd (%p54_p1), [#allocation9], 4294964736  ;;  %v2742_v0 = vld [vmem:[%s4569_s2 + $0x38] sm:$0xff]  ;;  %v2741_v1 = vld [vmem:[%s4569_s2 + $0x30] sm:$0xff]  ;;  %s2426_s5 = sshll.u32 %s3485_s21, 4  ;;  %s3401_s26 = smov 64  }
  0x45   : > { %2821 = vmatpush.bf16.msra.mxu1 %v2742_v0  ;;  %767 = vmatpush.bf16.msra.mxu0 %v2742_v0  ;;  %v2740_v2 = vld [vmem:[%s4569_s2 + $0x28] sm:$0xff]  ;;  %v2739_v3 = vld [vmem:[%s4569_s2 + $0x20] sm:$0xff]  ;;  %v2738_v4 = vld [vmem:[%s4569_s2 + $0x18] sm:$0xff]  ;;  %p499_p1 = scmp.lt.s32.totalorder %s2426_s5, 31  ;;  %s3770_s12 = scalar_lea.vmem [#allocation12], %s3587_s8  ;;  %vm1258_vm0 = vcmask 523264  }
  0x46   : > { %v2737_v5 = vld [vmem:[%s4569_s2 + $0x10] sm:$0xff]  ;;  %v2736_v6 = vld [vmem:[%s4569_s2 + $0x8] sm:$0xff]  ;;  %v2735_v7 = vld [vmem:[%s4569_s2] sm:$0xff]  ;;  %s4040_s29 = scalar_lea.vmem [#allocation11], %s3587_s8  ;;  %s2780_s8 = sshll.u32 %s3485_s21, 7 }
  0x47   : > { %v2462_v8 = vld [vmem:[%s3591_s27 + $0x40] sm:$0xf]  ;;  %v2728_v9 = vld [vmem:[%s3591_s27 + $0x44] sm:$0xf0]  ;;  %v2750_v10 = vld [vmem:[%s4569_s2 + $0x78] sm:$0xff]  ;;  %s4661_s5 = smov (!%p499_p1, %s2426_s5), 31 }
  0x48   : > { %v2463_v11 = vor.u32 %v2728_v9, %v2462_v8  ;;  %v2749_v12 = vld [vmem:[%s4569_s2 + $0x70] sm:$0xff]  ;;  %v2748_v13 = vld [vmem:[%s4569_s2 + $0x68] sm:$0xff]  ;;  %v2747_v14 = vld [vmem:[%s4569_s2 + $0x60] sm:$0xff]  ;;  %s2427_s28 = sshll.u32 %s4661_s5, 2  ;;  %s3305_s22 = scalar_lea.hbm %s4578_s11, 256 }
  0x49   : > { %2822 = vmatpush.bf16.msra.mxu1 %v2741_v1  ;;  %768 = vmatpush.bf16.msra.mxu0 %v2741_v1  ;;  %v2470_v15 = vld [vmem:[%s3591_s27 + $0x50] sm:$0xf]  ;;  %v2730_v16 = vld [vmem:[%s3591_s27 + $0x54] sm:$0xf0]  ;;  %v2430_v20 = vld [vmem:[%s3591_s27] sm:$0xf]  ;;  %s3732_s23 = scalar_lea.vmem %s4568_s1, %s2427_s28  ;;  %s2247_s28 = scalar_lea.hbm %s4578_s11, %s2780_s8 }
  0x4a   : > { %v2746_v17 = vld [vmem:[%s4569_s2 + $0x58] sm:$0xff]  ;;  %v2471_v18 = vor.u32 %v2730_v16, %v2470_v15  ;;  %v2745_v19 = vld [vmem:[%s4569_s2 + $0x50] sm:$0xff]  ;;  %v2720_v21 = vld [vmem:[%s3591_s27 + $0x4] sm:$0xf0]  ;;  %s2250_s25 = sshll.u32 %s2247_s28, 4  ;;  %s2251_s25 = int_to_ptr.hbm [resolvable:$true] %s2250_s25 }
  0x4b   : > { %v2431_v22 = vor.u32 %v2720_v21, %v2430_v20  ;;  %v2744_v23 = vld [vmem:[%s4569_s2 + $0x48] sm:$0xff]  ;;  %v2743_v24 = vld [vmem:[%s4569_s2 + $0x40] sm:$0xff]  ;;  %v2438_v28 = vld [vmem:[%s3591_s27 + $0x10] sm:$0xf] }
  0x4c   : > { %v2478_v25 = vld [vmem:[%s3591_s27 + $0x60] sm:$0xf]  ;;  %v2732_v26 = vld [vmem:[%s3591_s27 + $0x64] sm:$0xf0]  ;;  %v2722_v29 = vld [vmem:[%s3591_s27 + $0x14] sm:$0xf0] }
  0x4d   : > { %2823 = vmatpush.bf16.msra.mxu1 %v2740_v2  ;;  %769 = vmatpush.bf16.msra.mxu0 %v2740_v2  ;;  %v2479_v27 = vor.u32 %v2732_v26, %v2478_v25  ;;  %v2439_v30 = vor.u32 %v2722_v29, %v2438_v28  ;;  %v2486_v31 = vld [vmem:[%s3591_s27 + $0x70] sm:$0xf]  ;;  %v2734_v32 = vld [vmem:[%s3591_s27 + $0x74] sm:$0xf0]  ;;  %v2446_v34 = vld [vmem:[%s3591_s27 + $0x20] sm:$0xf] }
  0x4e   : > { %v2487_v33 = vor.u32 %v2734_v32, %v2486_v31  ;;  %v2724_v35 = vld [vmem:[%s3591_s27 + $0x24] sm:$0xf0]  ;;  %v2719_v37 = vld [vmem:[%s3591_s27 + $0x4] sm:$0xf]  ;;  %v2432_v38 = vld [vmem:[%s3591_s27 + $0x8] sm:$0xf0] }
  0x4f   : > { %v2447_v36 = vor.u32 %v2724_v35, %v2446_v34  ;;  %v2435_v39 = vor.u32 %v2719_v37, %v2432_v38  ;;  %v2454_v40 = vld [vmem:[%s3591_s27 + $0x30] sm:$0xf]  ;;  %v2726_v41 = vld [vmem:[%s3591_s27 + $0x34] sm:$0xf0]  ;;  %v2721_v43 = vld [vmem:[%s3591_s27 + $0x14] sm:$0xf] }
  0x50   : > { %v2455_v42 = vor.u32 %v2726_v41, %v2454_v40  ;;  %v2440_v44 = vld [vmem:[%s3591_s27 + $0x18] sm:$0xf0]  ;;  %v2723_v46 = vld [vmem:[%s3591_s27 + $0x24] sm:$0xf]  ;;  %v2448_v47 = vld [vmem:[%s3591_s27 + $0x28] sm:$0xf0] }
  0x51   : > { %2824 = vmatpush.bf16.msra.mxu1 %v2739_v3  ;;  %770 = vmatpush.bf16.msra.mxu0 %v2739_v3  ;;  %v2443_v45 = vor.u32 %v2721_v43, %v2440_v44  ;;  %v2451_v48 = vor.u32 %v2723_v46, %v2448_v47  ;;  %v2725_v49 = vld [vmem:[%s3591_s27 + $0x34] sm:$0xf]  ;;  %v2456_v50 = vld [vmem:[%s3591_s27 + $0x38] sm:$0xf0]  ;;  %v2727_v52 = vld [vmem:[%s3591_s27 + $0x44] sm:$0xf] }
  0x52   : > { %v2459_v51 = vor.u32 %v2725_v49, %v2456_v50  ;;  %v2464_v53 = vld [vmem:[%s3591_s27 + $0x48] sm:$0xf0]  ;;  %v2729_v57 = vld [vmem:[%s3591_s27 + $0x54] sm:$0xf]  ;;  %v2472_v58 = vld [vmem:[%s3591_s27 + $0x58] sm:$0xf0] }
  0x53   : > { %v2467_v54 = vor.u32 %v2727_v52, %v2464_v53  ;;  %v2758_v59 = vld [vmem:[%s4571_s4 + $0x38] sm:$0xff]  ;;  %v2475_v60 = vor.u32 %v2729_v57, %v2472_v58  ;;  %v2757_v62 = vld [vmem:[%s4571_s4 + $0x30] sm:$0xff]  ;;  %v2756_v63 = vld [vmem:[%s4571_s4 + $0x28] sm:$0xff] }
  0x54   : > { %957 = vmatpush.bf16.msra.mxu2 %v2758_v59  ;;  %v2755_v1 = vld [vmem:[%s4571_s4 + $0x20] sm:$0xff]  ;;  %v2480_v3 = vld [vmem:[%s3591_s27 + $0x68] sm:$0xf0]  ;;  %v2815_v53 = vld [vmem:[%s3732_s23 + $0x10] sm:$0xff]  }
  0x55   : > { %2825 = vmatpush.bf16.msra.mxu1 %v2738_v4  ;;  %771 = vmatpush.bf16.msra.mxu0 %v2738_v4  ;;  %v2731_v2 = vld [vmem:[%s3591_s27 + $0x64] sm:$0xf]  ;;  %v2754_v4 = vld [vmem:[%s4571_s4 + $0x18] sm:$0xff]  ;;  %v2752_v8 = vld [vmem:[%s4571_s4 + $0x8] sm:$0xff]  ;;  %v2793_v57 = vunpack.c.h.bf16 %v2815_v53 }
  0x56   : > { %v3726_v20 = vld [vmem:[#allocation5] ss:$0 sm:$0xff] }
  0x58   : > { %958 = vmatpush.bf16.msra.mxu2 %v2757_v62 }
  0x59   : > { %2826 = vmatpush.bf16.msra.mxu1 %v2737_v5  ;;  %772 = vmatpush.bf16.msra.mxu0 %v2737_v5  ;;  %v2483_v5 = vor.u32 %v2731_v2, %v2480_v3 }
  0x5c   : > { %959 = vmatpush.bf16.msra.mxu2 %v2756_v63 }
  0x5d   : > { %2827 = vmatpush.bf16.msra.mxu1 %v2736_v6  ;;  %773 = vmatpush.bf16.msra.mxu0 %v2736_v6 }
  0x60   : > { %960 = vmatpush.bf16.msra.mxu2 %v2755_v1 }
  0x61   : > { %2828 = vmatpush.bf16.msra.mxu1 %v2735_v7  ;;  %774 = vmatpush.bf16.msra.mxu0 %v2735_v7  ;;  %v2753_v7 = vld [vmem:[%s4571_s4 + $0x10] sm:$0xff] }
  0x64   : > { %795 = vmatmul.bf16.vlgmr.msra.gmra.mxu1 %v2463_v11  ;;  %775 = vmatmul.bf16.vlgmr.msra.gmra.mxu0 %v2431_v22  ;;  %v2733_v11 = vld [vmem:[%s3591_s27 + $0x74] sm:$0xf]  ;;  %v2783_v22 = vld [vmem:[%s3732_s23] sm:$0xff]  }
  0x65   : > { %816 = vmatpush.bf16.msrb.mxu1 %v2750_v10  ;;  %961 = vmatpush.bf16.msra.mxu2 %v2754_v4  ;;  %v2751_v10 = vld [vmem:[%s4571_s4] sm:$0xff]  ;;  %v2784_v25 = vunpack.c.l.bf16 %v2783_v22  ;;  %v2785_v26 = vunpack.c.h.bf16 %v2783_v22 }
  0x67   : > { %v2932_v29 = vpack.i.bf16 %v2785_v26, %v2784_v25 }
  0x69   : > { %817 = vmatpush.bf16.msrb.mxu1 %v2749_v12  ;;  %962 = vmatpush.bf16.msra.mxu2 %v2753_v7  ;;  %v2488_v12 = vld [vmem:[%s3591_s27 + $0x78] sm:$0xf0]  ;;  %s2248_s27 = sshll.u32 %s3770_s12, 4  ;;  %s4131_s27 = int_to_ptr.vmem [resolvable:$true] %s2248_s27 }
  0x6a   : > { %2933 = vrot.lane.b32.xlu0 %v2932_v29, %s3401_s26 }
  0x6d   : > { %818 = vmatpush.bf16.msrb.mxu1 %v2748_v13  ;;  %963 = vmatpush.bf16.msra.mxu2 %v2752_v8 }
  0x71   : > { %819 = vmatpush.bf16.msrb.mxu1 %v2747_v14  ;;  %964 = vmatpush.bf16.msra.mxu2 %v2751_v10  ;;  %v2491_v14 = vor.u32 %v2733_v11, %v2488_v12 }
  0x74   : > { %800 = vmatmul.bf16.gmra.mxu1 %v2471_v18  ;;  %780 = vmatmul.bf16.gmra.mxu0 %v2439_v30 }
  0x75   : > { %820 = vmatpush.bf16.msrb.mxu1 %v2746_v17 }
  0x79   : > { %821 = vmatpush.bf16.msrb.mxu1 %v2745_v19 }
  0x7d   : > { %822 = vmatpush.bf16.msrb.mxu1 %v2744_v23 }
  0x81   : > { %823 = vmatpush.bf16.msrb.mxu1 %v2743_v24 }
  0x84   : > { %805 = vmatmul.bf16.gmra.mxu1 %v2479_v27  ;;  %785 = vmatmul.bf16.gmra.mxu0 %v2447_v36 }
  0x94   : > { %810 = vmatmul.bf16.gmra.mxu1 %v2487_v33  ;;  %790 = vmatmul.bf16.gmra.mxu0 %v2455_v42 }
  0xa4   : > { %824 = vmatmul.bf16.vlgmr.msrb.gmra.mxu1 %v2435_v39  ;;  %v2814_v39 = vld [vmem:[%s3732_s23 + $0x8] sm:$0xff]  }
  0xa5   : > { %v2788_v40 = vunpack.c.l.bf16 %v2814_v39  ;;  %v2789_v41 = vunpack.c.h.bf16 %v2814_v39 }
  0xb4   : > { %829 = vmatmul.bf16.gmra.mxu1 %v2443_v45  ;;  %v2937_v45 = vpack.i.bf16 %v2789_v41, %v2788_v40 }
  0xb6   : > { %2938 = vrot.lane.b32.xlu0 %v2937_v45, %s3401_s26 }
  0xc4   : > { %834 = vmatmul.bf16.gmra.mxu1 %v2451_v48 }
  0xd4   : > { %839 = vmatmul.bf16.gmra.mxu1 %v2459_v51 }
  0xe1   : > { %v3679_v55 = vpop.f32.mrf.mxu1  ;;  %v776_v13 = vpop.f32.mrf.mxu0 }
  0xe2   : > { %v777_v21 = vadd.f32 %v3726_v20, %v776_v13 }
  0xe4   : > { %844 = vmatmul.bf16.gmra.mxu1 %v2467_v54  ;;  %v2792_v54 = vunpack.c.l.bf16 %v2815_v53 }
  0xe6   : > { %v2942_v63 = vpack.i.bf16 %v2793_v57, %v2792_v54 }
  0xe8   : > { %2943 = vrot.lane.b32.xlu1 %v2942_v63, %s3401_s26 }
  0xe9   : > { %v3681_v56 = vpop.f32.mrf.mxu1  ;;  %v778_v17 = vpop.f32.mrf.mxu0 }
  0xea   : > { %v779_v23 = vadd.f32 %v3726_v20, %v778_v17 }
  0xf1   : > { %v3688_v61 = vpop.f32.mrf.mxu1  ;;  %v781_v19 = vpop.f32.mrf.mxu0 }
  0xf2   : > { %v782_v35 = vadd.f32 %v3726_v20, %v781_v19  ;;  %v799_v19 = vadd.f32 %v3726_v20, %v3681_v56 }
  0xf4   : > { %849 = vmatmul.bf16.gmra.mxu1 %v2475_v60 }
  0xf9   : > { %v3696_v0 = vpop.f32.mrf.mxu1  ;;  %v783_v30 = vpop.f32.mrf.mxu0 }
  0xfa   : > { %v784_v38 = vadd.f32 %v3726_v20, %v783_v30  ;;  %v804_v29 = vadd.f32 %v3726_v20, %v3696_v0 }
 0x101   : > { %v3706_v6 = vpop.f32.mrf.mxu1  ;;  %v786_v36 = vpop.f32.mrf.mxu0 }
 0x102   : > { %v787_v50 = vadd.f32 %v3726_v20, %v786_v36 }
 0x104   : > { %854 = vmatmul.bf16.gmra.mxu1 %v2483_v5 }
 0x109   : > { %v3714_v9 = vpop.f32.mrf.mxu1  ;;  %v788_v48 = vpop.f32.mrf.mxu0 }
 0x10a   : > { %v789_v52 = vadd.f32 %v3726_v20, %v788_v48  ;;  %v809_v36 = vadd.f32 %v3726_v20, %v3714_v9  ;;  %v3763_v48 = vld [vmem:[#allocation7] ss:$0 sm:$0xff] }
 0x111   : > { %v3721_v15 = vpop.f32.mrf.mxu1  ;;  %v791_v59 = vpop.f32.mrf.mxu0 }
 0x112   : > { %v792_v4 = vadd.f32 %v3726_v20, %v791_v59 }
 0x114   : > { %859 = vmatmul.bf16.gmra.mxu1 %v2491_v14 }
 0x119   : > { %v3724_v16 = vpop.f32.mrf.mxu1  ;;  %v793_v5 = vpop.f32.mrf.mxu0 }
 0x11a   : > { %v794_v8 = vadd.f32 %v3726_v20, %v793_v5 }
 0x121   : > { %v825_v18 = vpop.f32.mrf.mxu1 }
 0x122   : > { %v826_v24 = vadd.f32 %v825_v18, %v777_v21  ;;  %v797_v18 = vadd.f32 %v3726_v20, %v3679_v55 }
 0x124   : > { %v865_v31 = vmax.f32 %v826_v24, 0.0 }
 0x129   : > { %v827_v27 = vpop.f32.mrf.mxu1 }
 0x12a   : > { %v828_v28 = vadd.f32 %v827_v27, %v779_v23 }
 0x12c   : > { %v866_v32 = vmax.f32 %v828_v28, 0.0  ;;  %v802_v28 = vadd.f32 %v3726_v20, %v3688_v61 }
 0x12e   : > { %v881_v33 = vpack.c.bf16 %v866_v32, %v865_v31 }
 0x130   : > { %965 = vmatmul.bf16.vlgmr.msra.gmra.mxu2 %v881_v33 }
 0x131   : > { %v830_v34 = vpop.f32.mrf.mxu1 }
 0x132   : > { %v831_v37 = vadd.f32 %v830_v34, %v782_v35  ;;  %v807_v35 = vadd.f32 %v3726_v20, %v3706_v6 }
 0x134   : > { %v867_v43 = vmax.f32 %v831_v37, 0.0 }
 0x139   : > { %v832_v42 = vpop.f32.mrf.mxu1 }
 0x13a   : > { %v833_v44 = vadd.f32 %v832_v42, %v784_v38  ;;  %v812_v42 = vadd.f32 %v3726_v20, %v3721_v15 }
 0x13c   : > { %v868_v46 = vmax.f32 %v833_v44, 0.0 }
 0x13e   : > { %v882_v47 = vpack.c.bf16 %v868_v46, %v867_v43  ;;  %v814_v43 = vadd.f32 %v3726_v20, %v3724_v16  ;;  %v2934_v16 = vpop.permute.xlu0 %2933 }
 0x13f   : > { %v2935_v53 = vunpack.i.l.bf16 %v2934_v16  ;;  %v2936_v63 = vunpack.i.h.bf16 %v2934_v16 }
 0x140   : > { %970 = vmatmul.bf16.gmra.mxu2 %v882_v47 }
 0x141   : > { %v835_v49 = vpop.f32.mrf.mxu1 }
 0x142   : > { %v836_v51 = vadd.f32 %v835_v49, %v787_v50 }
 0x144   : > { %v869_v60 = vmax.f32 %v836_v51, 0.0 }
 0x149   : > { %v837_v58 = vpop.f32.mrf.mxu1 }
 0x14a   : > { %v838_v62 = vadd.f32 %v837_v58, %v789_v52 }
 0x14c   : > { %v870_v1 = vmax.f32 %v838_v62, 0.0 }
 0x14e   : > { %v883_v2 = vpack.c.bf16 %v870_v1, %v869_v60 }
 0x150   : > { %975 = vmatmul.bf16.gmra.mxu2 %v883_v2 }
 0x151   : > { %v840_v3 = vpop.f32.mrf.mxu1 }
 0x152   : > { %v841_v7 = vadd.f32 %v840_v3, %v792_v4  ;;  %v2816_v4 = vld [vmem:[%s3732_s23 + $0x18] sm:$0xff]  }
 0x154   : > { %v871_v11 = vmax.f32 %v841_v7, 0.0  ;;  %v2939_v7 = vpop.permute.xlu0 %2938 }
 0x159   : > { %v842_v10 = vpop.f32.mrf.mxu1 }
 0x15a   : > { %v843_v12 = vadd.f32 %v842_v10, %v794_v8  ;;  %v2796_v10 = vunpack.c.l.bf16 %v2816_v4 }
 0x15c   : > { %v872_v13 = vmax.f32 %v843_v12, 0.0 }
 0x15e   : > { %v884_v14 = vpack.c.bf16 %v872_v13, %v871_v11  ;;  %v2797_v11 = vunpack.c.h.bf16 %v2816_v4  ;;  %v2940_v13 = vunpack.i.l.bf16 %v2939_v7 }
 0x160   : > { %980 = vmatmul.bf16.gmra.mxu2 %v884_v14 }
 0x161   : > { %v845_v17 = vpop.f32.mrf.mxu1 }
 0x162   : > { %v846_v21 = vadd.f32 %v845_v17, %v797_v18  ;;  %v2947_v17 = vpack.i.bf16 %v2797_v11, %v2796_v10  ;;  %v2759_v10 = vld [vmem:[#allocation8] sm:$0xff] }
 0x164   : > { %v873_v24 = vmax.f32 %v846_v21, 0.0  ;;  %v2817_v21 = vld [vmem:[%s3732_s23 + $0x20] sm:$0xff]  }
 0x169   : > { %v847_v22 = vpop.f32.mrf.mxu1 }
 0x16a   : > { %v848_v23 = vadd.f32 %v847_v22, %v799_v19 }
 0x16c   : > { %v874_v25 = vmax.f32 %v848_v23, 0.0 }
 0x16e   : > { %v885_v26 = vpack.c.bf16 %v874_v25, %v873_v24  ;;  %v2800_v24 = vunpack.c.l.bf16 %v2817_v21  ;;  %v2801_v25 = vunpack.c.h.bf16 %v2817_v21 }
 0x170   : > { %985 = vmatmul.bf16.gmra.mxu2 %v885_v26 }
 0x171   : > { %v850_v27 = vpop.f32.mrf.mxu1 }
 0x172   : > { %v851_v30 = vadd.f32 %v850_v27, %v802_v28  ;;  %v2941_v27 = vunpack.i.h.bf16 %v2939_v7 }
 0x174   : > { %v875_v32 = vmax.f32 %v851_v30, 0.0 }
 0x179   : > { %v852_v31 = vpop.f32.mrf.mxu1 }
 0x17a   : > { %v853_v55 = vadd.f32 %v852_v31, %v804_v29  ;;  %v2952_v29 = vpack.i.bf16 %v2801_v25, %v2800_v24 }
 0x17c   : > { %v876_v33 = vmax.f32 %v853_v55, 0.0  ;;  %v2818_v55 = vld [vmem:[%s3732_s23 + $0x28] sm:$0xff]  }
 0x17e   : > { %v886_v56 = vpack.c.bf16 %v876_v33, %v875_v32  ;;  %v2944_v33 = vpop.permute.xlu1 %2943 }
 0x180   : > { %990 = vmatmul.bf16.gmra.mxu2 %v886_v56  ;;  %v2762_v56 = vld [vmem:[#allocation8 + $0x18] sm:$0xff] }
 0x181   : > { %v855_v34 = vpop.f32.mrf.mxu1  ;;  %1287 = vmatpush.bf16.msrb.mxu2 %v2762_v56  ;;  %2829 = vmatpush.bf16.msra.mxu3 %v2762_v56 }
 0x182   : > { %v856_v37 = vadd.f32 %v855_v34, %v807_v35  ;;  %v2804_v35 = vunpack.c.l.bf16 %v2818_v55 }
 0x184   : > { %v877_v39 = vmax.f32 %v856_v37, 0.0 }
 0x189   : > { %v857_v38 = vpop.f32.mrf.mxu1 }
 0x18a   : > { %v858_v61 = vadd.f32 %v857_v38, %v809_v36  ;;  %v2805_v36 = vunpack.c.h.bf16 %v2818_v55  ;;  %v2945_v38 = vunpack.i.l.bf16 %v2944_v33 }
 0x18c   : > { %v878_v40 = vmax.f32 %v858_v61, 0.0 }
 0x18e   : > { %v887_v0 = vpack.c.bf16 %v878_v40, %v877_v39  ;;  %v2957_v39 = vpack.i.bf16 %v2805_v36, %v2804_v35 }
 0x190   : > { %995 = vmatmul.bf16.gmra.mxu2 %v887_v0 }
 0x191   : > { %v860_v41 = vpop.f32.mrf.mxu1 }
 0x192   : > { %v861_v44 = vadd.f32 %v860_v41, %v812_v42  ;;  %v2819_v41 = vld [vmem:[%s3732_s23 + $0x30] sm:$0xff]  }
 0x194   : > { %v879_v46 = vmax.f32 %v861_v44, 0.0  ;;  %v2808_v44 = vunpack.c.l.bf16 %v2819_v41 }
 0x199   : > { %v862_v6 = vpop.f32.mrf.mxu1 }
 0x19a   : > { %v863_v45 = vadd.f32 %v862_v6, %v814_v43  ;;  %v2809_v6 = vunpack.c.h.bf16 %v2819_v41 }
 0x19c   : > { %v880_v9 = vmax.f32 %v863_v45, 0.0 }
 0x19e   : > { %v888_v47 = vpack.c.bf16 %v880_v9, %v879_v46  ;;  %v2946_v46 = vunpack.i.h.bf16 %v2944_v33  ;;  %v2962_v9 = vpack.i.bf16 %v2809_v6, %v2808_v44 }
 0x1a0   : > { %1000 = vmatmul.bf16.gmra.mxu2 %v888_v47 }
 0x1b3   : > { %v966_v49 = vpop.f32.mrf.mxu2 }
 0x1b4   : > { %v3766_v50 = vadd.f32 %v3763_v48, %v966_v49  ;;  %v2820_v49 = vld [vmem:[%s3732_s23 + $0x38] sm:$0xff]   ;;  %s2218_s23 = scalar_lea.sflag [#allocation13], %s3584_s6 }
 0x1b5   : > { %v2812_v16 = vunpack.c.l.bf16 %v2820_v49 }
 0x1b6   : > { %v1006_v51 = vmul.f32 0.5, %v3766_v50  ;;  %2196 = vst [vmem:[%s3770_s12] sm:$0xff] %v3766_v50 }
 0x1b8   : > { %v1022_v15 = vmul.f32 1.442695, %v1006_v51 }
 0x1ba   : > { %2975 = vpow2.f32 %v1022_v15 }
 0x1bb   : > { %v968_v20 = vpop.f32.mrf.mxu2 }
 0x1bc   : > { %v3775_v52 = vadd.f32 %v3763_v48, %v968_v20  ;;  %v2813_v20 = vunpack.c.h.bf16 %v2820_v49 }
 0x1be   : > { %v1007_v54 = vmul.f32 0.5, %v3775_v52  ;;  %2197 = vst [vmem:[%s3770_s12 + $0x8] sm:$0xff] %v3775_v52 }
 0x1c0   : > { %v2976_v57 = vpop.eup %2975  ;;  %v1024_v58 = vmul.f32 1.442695, %v1007_v54  ;;  %v2967_v54 = vpack.i.bf16 %v2813_v20, %v2812_v16 }
 0x1c1   : > { %v1118_v59 = vmul.f32 %v2976_v57, %v2935_v53 }
 0x1c2   : > { %2977 = vpow2.f32 %v1024_v58 }
 0x1c3   : > { %v971_v60 = vpop.f32.mrf.mxu2  ;;  %1150 = vrot.lane.b32.xlu1 %v1118_v59, %s3401_s26  ;;  %v2761_v59 = vld [vmem:[#allocation8 + $0x10] sm:$0xff] }
 0x1c4   : > { %v3782_v62 = vadd.f32 %v3763_v48, %v971_v60  ;;  %1288 = vmatpush.bf16.msrb.mxu2 %v2761_v59  ;;  %2830 = vmatpush.bf16.msra.mxu3 %v2761_v59 }
 0x1c6   : > { %v1008_v1 = vmul.f32 0.5, %v3782_v62  ;;  %2198 = vst [vmem:[%s3770_s12 + $0x10] sm:$0xff] %v3782_v62 }
 0x1c8   : > { %v2978_v2 = vpop.eup %2977  ;;  %v1026_v3 = vmul.f32 1.442695, %v1008_v1 }
 0x1c9   : > { %v1119_v5 = vmul.f32 %v2978_v2, %v2936_v63 }
 0x1ca   : > { %2979 = vpow2.f32 %v1026_v3 }
 0x1cb   : > { %v973_v8 = vpop.f32.mrf.mxu2  ;;  %1152 = vrot.lane.b32.xlu2 %v1119_v5, %s3401_s26  ;;  %v2760_v5 = vld [vmem:[#allocation8 + $0x8] sm:$0xff] }
 0x1cc   : > { %v3790_v12 = vadd.f32 %v3763_v48, %v973_v8  ;;  %1289 = vmatpush.bf16.msrb.mxu2 %v2760_v5  ;;  %2831 = vmatpush.bf16.msra.mxu3 %v2760_v5 }
 0x1ce   : > { %v1009_v14 = vmul.f32 0.5, %v3790_v12  ;;  %2199 = vst [vmem:[%s3770_s12 + $0x18] sm:$0xff] %v3790_v12 }
 0x1d0   : > { %v2980_v18 = vpop.eup %2979  ;;  %v1028_v19 = vmul.f32 1.442695, %v1009_v14  ;;  %1290 = vmatpush.bf16.msrb.mxu2 %v2759_v10  ;;  %2832 = vmatpush.bf16.msra.mxu3 %v2759_v10 }
 0x1d1   : > { %v1120_v22 = vmul.f32 %v2980_v18, %v2940_v13 }
 0x1d2   : > { %2981 = vpow2.f32 %v1028_v19 }
 0x1d3   : > { %v976_v23 = vpop.f32.mrf.mxu2  ;;  %1154 = vrot.lane.b32.xlu0 %v1120_v22, %s3401_s26  ;;  %2948 = vrot.lane.b32.xlu2 %v2947_v17, %s3401_s26 }
 0x1d4   : > { %v3799_v26 = vadd.f32 %v3763_v48, %v976_v23 }
 0x1d6   : > { %v1010_v28 = vmul.f32 0.5, %v3799_v26  ;;  %2200 = vst [vmem:[%s3770_s12 + $0x20] sm:$0xff] %v3799_v26 }
 0x1d8   : > { %v2982_v30 = vpop.eup %2981  ;;  %v1030_v31 = vmul.f32 1.442695, %v1010_v28 }
 0x1d9   : > { %v1121_v32 = vmul.f32 %v2982_v30, %v2941_v27 }
 0x1da   : > { %2983 = vpow2.f32 %v1030_v31 }
 0x1db   : > { %v978_v34 = vpop.f32.mrf.mxu2  ;;  %2953 = vrot.lane.b32.xlu2 %v2952_v29, %s3401_s26  ;;  %1156 = vrot.lane.b32.xlu1 %v1121_v32, %s3401_s26 }
 0x1dc   : > { %v3808_v37 = vadd.f32 %v3763_v48, %v978_v34 }
 0x1de   : > { %v1011_v61 = vmul.f32 0.5, %v3808_v37  ;;  %2201 = vst [vmem:[%s3770_s12 + $0x28] sm:$0xff] %v3808_v37 }
 0x1e0   : > { %v2984_v40 = vpop.eup %2983  ;;  %v1032_v0 = vmul.f32 1.442695, %v1011_v61 }
 0x1e1   : > { %v1122_v42 = vmul.f32 %v2984_v40, %v2945_v38 }
 0x1e2   : > { %2985 = vpow2.f32 %v1032_v0 }
 0x1e3   : > { %v981_v43 = vpop.f32.mrf.mxu2  ;;  %1158 = vrot.lane.b32.xlu0 %v1122_v42, %s3401_s26  ;;  %2958 = vrot.lane.b32.xlu2 %v2957_v39, %s3401_s26 }
 0x1e4   : > { %v3817_v45 = vadd.f32 %v3763_v48, %v981_v43 }
 0x1e6   : > { %2202 = vst [vmem:[%s3770_s12 + $0x30] sm:$0xff] %v3817_v45  ;;  %v1012_v14 = vmul.f32 0.5, %v3817_v45 }
 0x1e8   : > { %v2986_v47 = vpop.eup %2985  ;;  %v1034_v19 = vmul.f32 1.442695, %v1012_v14 }
 0x1e9   : > { %v1123_v51 = vmul.f32 %v2986_v47, %v2946_v46 }
 0x1ea   : > { %2987 = vpow2.f32 %v1034_v19 }
 0x1eb   : > { %v983_v15 = vpop.f32.mrf.mxu2  ;;  %2963 = vrot.lane.b32.xlu2 %v2962_v9, %s3401_s26  ;;  %1160 = vrot.lane.b32.xlu1 %v1123_v51, %s3401_s26 }
 0x1ec   : > { %v3825_v53 = vadd.f32 %v3763_v48, %v983_v15 }
 0x1ee   : > { %2203 = vst [vmem:[%s3770_s12 + $0x38] sm:$0xff] %v3825_v53  ;;  %v1013_v17 = vmul.f32 0.5, %v3825_v53 }
 0x1f0   : > { %v1036_v22 = vmul.f32 1.442695, %v1013_v17  ;;  %v2988_v55 = vpop.eup %2987 }
 0x1f2   : > { %2989 = vpow2.f32 %v1036_v22 }
 0x1f3   : > { %v986_v57 = vpop.f32.mrf.mxu2  ;;  %2968 = vrot.lane.b32.xlu2 %v2967_v54, %s3401_s26 }
 0x1f4   : > { %v3831_v58 = vadd.f32 %v3763_v48, %v986_v57 }
 0x1f6   : > { %2204 = vst [vmem:[%s3770_s12 + $0x40] sm:$0xff] %v3831_v58  ;;  %v1014_v24 = vmul.f32 0.5, %v3831_v58 }
 0x1f8   : > { %v1038_v28 = vmul.f32 1.442695, %v1014_v24  ;;  %v2990_v56 = vpop.eup %2989 }
 0x1fa   : > { %2991 = vpow2.f32 %v1038_v28 }
 0x1fb   : > { %v988_v60 = vpop.f32.mrf.mxu2 }
 0x1fc   : > { %v3836_v63 = vadd.f32 %v3763_v48, %v988_v60 }
 0x1fe   : > { %2205 = vst [vmem:[%s3770_s12 + $0x48] sm:$0xff] %v3836_v63  ;;  %v1015_v25 = vmul.f32 0.5, %v3836_v63 }
 0x200   : > { %v1040_v30 = vmul.f32 1.442695, %v1015_v25  ;;  %v2992_v0 = vpop.eup %2991 }
 0x202   : > { %2993 = vpow2.f32 %v1040_v30 }
 0x203   : > { %v991_v1 = vpop.f32.mrf.mxu2 }
 0x204   : > { %v3841_v2 = vadd.f32 %v3763_v48, %v991_v1 }
 0x206   : > { %2206 = vst [vmem:[%s3770_s12 + $0x50] sm:$0xff] %v3841_v2  ;;  %v1016_v34 = vmul.f32 0.5, %v3841_v2 }
 0x208   : > { %v2994_v6 = vpop.eup %2993 }
 0x20b   : > { %v993_v3 = vpop.f32.mrf.mxu2 }
 0x20c   : > { %v3846_v4 = vadd.f32 %v3763_v48, %v993_v3 }
 0x20e   : > { %2207 = vst [vmem:[%s3770_s12 + $0x58] sm:$0xff] %v3846_v4  ;;  %v1017_v38 = vmul.f32 0.5, %v3846_v4 }
 0x210   : > { %v1044_v61 = vmul.f32 1.442695, %v1017_v38 }
 0x213   : > { %v996_v7 = vpop.f32.mrf.mxu2 }
 0x214   : > { %v3851_v8 = vadd.f32 %v3763_v48, %v996_v7 }
 0x216   : > { %2208 = vst [vmem:[%s3770_s12 + $0x60] sm:$0xff] %v3851_v8  ;;  %v1018_v46 = vmul.f32 0.5, %v3851_v8 }
 0x21b   : > { %v998_v11 = vpop.f32.mrf.mxu2 }
 0x21c   : > { %v3856_v13 = vadd.f32 %v3763_v48, %v998_v11 }
 0x21e   : > { %2209 = vst [vmem:[%s3770_s12 + $0x68] sm:$0xff] %v3856_v13  ;;  %v1019_v51 = vmul.f32 0.5, %v3856_v13 }
 0x223   : > { %v1001_v18 = vpop.f32.mrf.mxu2 }
 0x224   : > { %v3863_v21 = vadd.f32 %v3763_v48, %v1001_v18 }
 0x225   : > { %v1153_v23 = vpop.permute.xlu2 %1152 }
 0x226   : > { %2210 = vst [vmem:[%s3770_s12 + $0x70] sm:$0xff] %v3863_v21  ;;  %v1199_v41 = vadd.f32 %v1153_v23, %v3775_v52  ;;  %v1046_v52 = vmul.f32 1.442695, %v1018_v46  ;;  %v1020_v59 = vmul.f32 0.5, %v3863_v21  ;;  %v2648_v46 = vld [vmem:[#allocation10 + $0x48] sm:$0xf0] }
 0x228   : > { %v1050_v5 = vmul.f32 1.442695, %v1020_v59 }
 0x22b   : > { %v1003_v27 = vpop.f32.mrf.mxu2 }
 0x22c   : > { %v3870_v29 = vadd.f32 %v3763_v48, %v1003_v27  ;;  %v1042_v48 = vmul.f32 1.442695, %v1016_v34 }
 0x22d   : > { %v2949_v31 = vpop.permute.xlu2 %2948 }
 0x22e   : > { %2211 = vst [vmem:[%s3770_s12 + $0x78] sm:$0xff] %v3870_v29  ;;  %v2951_v32 = vunpack.i.h.bf16 %v2949_v31  ;;  %v2950_v33 = vunpack.i.l.bf16 %v2949_v31  ;;  %2995 = vpow2.f32 %v1042_v48  ;;  %v1021_v3 = vmul.f32 0.5, %v3870_v29 }
 0x22f   : > { %2997 = vpow2.f32 %v1044_v61  ;;  %v2672_v61 = vld [vmem:[#allocation10 + $0x78] sm:$0xf0] }
 0x230   : > { %v1125_v35 = vmul.f32 %v2990_v56, %v2951_v32  ;;  %v1124_v36 = vmul.f32 %v2988_v55, %v2950_v33  ;;  %2999 = vpow2.f32 %v1046_v52  ;;  %v1052_v7 = vmul.f32 1.442695, %v1021_v3 }
 0x232   : > { %1162 = vrot.lane.b32.xlu0 %v1124_v36, %s3401_s26  ;;  %1164 = vrot.lane.b32.xlu1 %v1125_v35, %s3401_s26 }
 0x234   : > { %v2996_v15 = vpop.eup %2995 }
 0x235   : > { %v2954_v39 = vpop.permute.xlu2 %2953  ;;  %v1151_v40 = vpop.permute.xlu1 %1150 }
 0x236   : > { %v2956_v42 = vunpack.i.h.bf16 %v2954_v39  ;;  %v2955_v43 = vunpack.i.l.bf16 %v2954_v39  ;;  %v1198_v44 = vadd.f32 %v1151_v40, %v3766_v50  ;;  %v1048_v50 = vmul.f32 1.442695, %v1019_v51  ;;  %v2998_v57 = vpop.eup %2997  ;;  %v2775_v40 = vld [vmem:[#allocation10 + $0x64] sm:$0xf]  ;;  %v2640_v51 = vld [vmem:[#allocation10 + $0x38] sm:$0xf0] }
 0x237   : > { %v3000_v11 = vpop.eup %2999 }
 0x238   : > { %v1127_v9 = vmul.f32 %v2994_v6, %v2956_v42  ;;  %v1126_v47 = vmul.f32 %v2992_v0, %v2955_v43  ;;  %v1214_v49 = vpack.c.bf16 %v1199_v41, %v1198_v44  ;;  %3001 = vpow2.f32 %v1048_v50  ;;  %v2664_v0 = vld [vmem:[#allocation10 + $0x68] sm:$0xf0]  ;;  %v2773_v42 = vld [vmem:[#allocation10 + $0x54] sm:$0xf]  ;;  %v2656_v43 = vld [vmem:[#allocation10 + $0x58] sm:$0xf0] }
 0x239   : > { %3003 = vpow2.f32 %v1050_v5  ;;  %v2667_v41 = vor.u32 %v2775_v40, %v2664_v0  ;;  %v2659_v44 = vor.u32 %v2773_v42, %v2656_v43  ;;  %v2771_v6 = vld [vmem:[#allocation10 + $0x44] sm:$0xf]  ;;  %v2632_v50 = vld [vmem:[#allocation10 + $0x28] sm:$0xf0]  ;;  %v2630_v0 = vld [vmem:[#allocation10 + $0x20] sm:$0xf] }
 0x23a   : > { %1166 = vrot.lane.b32.xlu0 %v1126_v47, %s3401_s26  ;;  %1168 = vrot.lane.b32.xlu1 %v1127_v9, %s3401_s26  ;;  %3005 = vpow2.f32 %v1052_v7  ;;  %v2778_v9 = vld [vmem:[#allocation10 + $0x74] sm:$0xf0]  ;;  %v2763_v5 = vld [vmem:[#allocation10 + $0x4] sm:$0xf]  ;;  %v2616_v7 = vld [vmem:[#allocation10 + $0x8] sm:$0xf0] }
 0x23b   : > { %2604 = vmatmul.msk.bf16.vlgmr.msrb.gmra.mxu2 %vm1258_vm0, %v1214_v49  ;;  %v2769_v49 = vld [vmem:[#allocation10 + $0x34] sm:$0xf]  ;;  %v2766_v43 = vld [vmem:[#allocation10 + $0x14] sm:$0xf0] }
 0x23c   : > { %v2643_v52 = vor.u32 %v2769_v49, %v2640_v51 }
 0x23d   : > { %v2959_v16 = vpop.permute.xlu2 %2958 }
 0x23e   : > { %v2961_v20 = vunpack.i.h.bf16 %v2959_v16  ;;  %v2960_v54 = vunpack.i.l.bf16 %v2959_v16  ;;  %v3002_v18 = vpop.eup %3001 }
 0x23f   : > { %v3004_v27 = vpop.eup %3003 }
 0x240   : > { %v1129_v60 = vmul.f32 %v2998_v57, %v2961_v20  ;;  %v1128_v1 = vmul.f32 %v2996_v15, %v2960_v54  ;;  %v3006_v32 = vpop.eup %3005  ;;  %v2767_v15 = vld [vmem:[#allocation10 + $0x24] sm:$0xf]  ;;  %v2765_v20 = vld [vmem:[#allocation10 + $0x14] sm:$0xf]  ;;  %v2624_v54 = vld [vmem:[#allocation10 + $0x18] sm:$0xf0] }
 0x241   : > { %v2635_v16 = vor.u32 %v2767_v15, %v2632_v50  ;;  %v2627_v59 = vor.u32 %v2765_v20, %v2624_v54 }
 0x242   : > { %1170 = vrot.lane.b32.xlu0 %v1128_v1, %s3401_s26  ;;  %1172 = vrot.lane.b32.xlu1 %v1129_v60, %s3401_s26 }
 0x245   : > { %v2964_v10 = vpop.permute.xlu2 %2963  ;;  %v1155_v23 = vpop.permute.xlu0 %1154 }
 0x246   : > { %v2966_v14 = vunpack.i.h.bf16 %v2964_v10  ;;  %v2965_v17 = vunpack.i.l.bf16 %v2964_v10  ;;  %v1200_v28 = vadd.f32 %v1155_v23, %v3782_v62 }
 0x248   : > { %v1131_v19 = vmul.f32 %v3002_v18, %v2966_v14  ;;  %v1130_v22 = vmul.f32 %v3000_v11, %v2965_v17  ;;  %v2619_v11 = vor.u32 %v2763_v5, %v2616_v7  ;;  %v2662_v14 = vld [vmem:[#allocation10 + $0x60] sm:$0xf]  ;;  %v2776_v17 = vld [vmem:[#allocation10 + $0x64] sm:$0xf0] }
 0x249   : > { %v2663_v18 = vor.u32 %v2776_v17, %v2662_v14 }
 0x24a   : > { %1174 = vrot.lane.b32.xlu2 %v1130_v22, %s3401_s26  ;;  %1176 = vrot.lane.b32.xlu0 %v1131_v19, %s3401_s26  ;;  %v2654_v19 = vld [vmem:[#allocation10 + $0x50] sm:$0xf]  ;;  %v2774_v22 = vld [vmem:[#allocation10 + $0x54] sm:$0xf0] }
 0x24b   : > { %v2655_v23 = vor.u32 %v2774_v22, %v2654_v19 }
 0x24d   : > { %v2969_v24 = vpop.permute.xlu2 %2968  ;;  %v1157_v25 = vpop.permute.xlu1 %1156 }
 0x24e   : > { %v2971_v30 = vunpack.i.h.bf16 %v2969_v24  ;;  %v2970_v31 = vunpack.i.l.bf16 %v2969_v24  ;;  %v1201_v55 = vadd.f32 %v1157_v25, %v3790_v12  ;;  %v2777_v12 = vld [vmem:[#allocation10 + $0x74] sm:$0xf] }
 0x24f   : > { %v2675_v39 = vor.u32 %v2777_v12, %v2672_v61 }
 0x250   : > { %v1133_v33 = vmul.f32 %v3006_v32, %v2971_v30  ;;  %v1132_v56 = vmul.f32 %v3004_v27, %v2970_v31  ;;  %v1215_v34 = vpack.c.bf16 %v1201_v55, %v1200_v28  ;;  %v2646_v28 = vld [vmem:[#allocation10 + $0x40] sm:$0xf]  ;;  %v2772_v30 = vld [vmem:[#allocation10 + $0x44] sm:$0xf0] }
 0x251   : > { %1507 = vmatpush.bf16.msrb.mxu0 %v2675_v39  ;;  %v2647_v31 = vor.u32 %v2772_v30, %v2646_v28 }
 0x252   : > { %1180 = vrot.lane.b32.xlu2 %v1133_v33, %s3401_s26  ;;  %1178 = vrot.lane.b32.xlu1 %v1132_v56, %s3401_s26  ;;  %v3908_v56 = vld [vmem:[%s4574_s7] ss:$0 sm:$0xff]  ;;  %s3299_s26 = sshra.s32 %s2251_s25, 4  ;;  %s3300_s26 = int_to_ptr.hbm [resolvable:$true] %s3299_s26 }
 0x253   : > { %2605 = vmatmul.msk.bf16.gmra.mxu2 %vm1258_vm0, %v1215_v34  ;;  %v2638_v34 = vld [vmem:[#allocation10 + $0x30] sm:$0xf]  ;;  %s3301_s12 = scalar_lea.hbm %s3300_s26, 128  ;;  %p3306_p10 = scmp.lt.s32.totalorder %s3300_s26, %s4578_s11 }
 0x254   : > { %p3302_p4 = scmp.ne.s32.totalorder %s3300_s26, %s3301_s12  ;;  %p3307_p2 = scmp.lt.s32.totalorder %s3305_s22, %s3301_s12 }
 0x255   : > { %v1159_v35 = vpop.permute.xlu0 %1158  ;;  %1508 = vmatpush.bf16.msrb.mxu0 %v2667_v41  ;;  %v2768_v41 = vld [vmem:[#allocation10 + $0x24] sm:$0xf0] }
 0x256   : > { %v1202_v38 = vadd.f32 %v1159_v35, %v3799_v26  ;;  %v2651_v26 = vor.u32 %v2771_v6, %v2648_v46  ;;  %v2770_v35 = vld [vmem:[#allocation10 + $0x34] sm:$0xf0]  ;;  %v2631_v42 = vor.u32 %v2768_v41, %v2630_v0  ;;  %p3303_p8 = pnand %p3302_p4, %p3554_p5  ;;  %p3308_p11 = por %p3307_p2, %p3306_p10 }
 0x258   : > { %p3304_p9 = pneg %p3303_p8 }
 0x259   : > { %1509 = vmatpush.bf16.msrb.mxu0 %v2659_v44 }
 0x25a   : > { %p3309_p12 = pnand %p3308_p11, %p3304_p9 }
 0x25d   : > { %v1161_v36 = vpop.permute.xlu1 %1160  ;;  %1510 = vmatpush.bf16.msrb.mxu0 %v2651_v26  ;;  %v2614_v26 = vld [vmem:[#allocation10] sm:$0xf] }
 0x25e   : > { %v1203_v62 = vadd.f32 %v1161_v36, %v3808_v37  ;;  %v2670_v37 = vld [vmem:[#allocation10 + $0x70] sm:$0xf] }
 0x25f   : > { %v2671_v47 = vor.u32 %v2778_v9, %v2670_v37  ;;  %v2764_v37 = vld [vmem:[#allocation10 + $0x4] sm:$0xf0] }
 0x260   : > { %v1216_v48 = vpack.c.bf16 %v1203_v62, %v1202_v38  ;;  %v2615_v9 = vor.u32 %v2764_v37, %v2614_v26 }
 0x261   : > { %1458 = vmatpush.bf16.msrb.mxu3 %v2671_v47  ;;  %1511 = vmatpush.bf16.msrb.mxu0 %v2643_v52 }
 0x263   : > { %2606 = vmatmul.msk.bf16.gmra.mxu2 %vm1258_vm0, %v1216_v48 }
 0x265   : > { %1512 = vmatpush.bf16.msrb.mxu0 %v2635_v16  ;;  %1459 = vmatpush.bf16.msrb.mxu3 %v2663_v18 }
 0x269   : > { %1513 = vmatpush.bf16.msrb.mxu0 %v2627_v59  ;;  %1460 = vmatpush.bf16.msrb.mxu3 %v2655_v23 }
 0x26d   : > { %1514 = vmatpush.bf16.msrb.mxu0 %v2619_v11  ;;  %1461 = vmatpush.bf16.msrb.mxu3 %v2647_v31 }
 0x2a4   : > { %v1163_v57 = vpop.permute.xlu0 %1162  ;;  %v1165_v1 = vpop.permute.xlu1 %1164 }
 0x2a5   : > { %v1204_v60 = vadd.f32 %v1163_v57, %v3817_v45  ;;  %v1205_v3 = vadd.f32 %v1165_v1, %v3825_v53  ;;  %v1175_v6 = vpop.permute.xlu2 %1174 }
 0x2a6   : > { %v1210_v47 = vadd.f32 %v1175_v6, %v3851_v8 }
 0x2a7   : > { %v1217_v10 = vpack.c.bf16 %v1205_v3, %v1204_v60 }
 0x2a9   : > { %2607 = vmatmul.msk.bf16.vlgmr.msra.gmra.mxu3 %vm1258_vm0, %v1217_v10 }
 0x2ac   : > { %v1167_v24 = vpop.permute.xlu0 %1166  ;;  %v1169_v45 = vpop.permute.xlu1 %1168 }
 0x2ad   : > { %v1206_v53 = vadd.f32 %v1167_v24, %v3831_v58  ;;  %v1207_v25 = vadd.f32 %v1169_v45, %v3836_v63  ;;  %v2639_v58 = vor.u32 %v2770_v35, %v2638_v34  ;;  %v1181_v57 = vpop.permute.xlu2 %1180 }
 0x2ae   : > { %v1213_v8 = vadd.f32 %v1181_v57, %v3870_v29 }
 0x2af   : > { %v1218_v27 = vpack.c.bf16 %v1207_v25, %v1206_v53  ;;  %1462 = vmatpush.bf16.msrb.mxu3 %v2639_v58 }
 0x2b3   : > { %1463 = vmatpush.bf16.msrb.mxu3 %v2631_v42 }
 0x2b4   : > { %v1171_v32 = vpop.permute.xlu0 %1170  ;;  %v1173_v33 = vpop.permute.xlu1 %1172 }
 0x2b5   : > { %v1208_v63 = vadd.f32 %v1171_v32, %v3841_v2  ;;  %v1209_v36 = vadd.f32 %v1173_v33, %v3846_v4  ;;  %v2622_v2 = vld [vmem:[#allocation10 + $0x10] sm:$0xf] }
 0x2b6   : > { %v2623_v44 = vor.u32 %v2766_v43, %v2622_v2 }
 0x2b7   : > { %v1219_v12 = vpack.c.bf16 %v1209_v36, %v1208_v63 }
 0x2b8   : > { %1464 = vmatpush.bf16.msrb.mxu3 %v2623_v44 }
 0x2b9   : > { %2608 = vmatmul.msk.bf16.gmra.mxu3 %vm1258_vm0, %v1218_v27 }
 0x2bc   : > { %v1177_v4 = vpop.permute.xlu0 %1176  ;;  %1465 = vmatpush.bf16.msrb.mxu3 %v2615_v9 }
 0x2bd   : > { %v1211_v46 = vadd.f32 %v1177_v4, %v3856_v13 }
 0x2be   : > { %v1292_v55 = vpop.f32.mrf.mxu2 }
 0x2bf   : > { %v1293_v38 = vadd.f32 %v3908_v56, %v1292_v55  ;;  %v1220_v51 = vpack.c.bf16 %v1211_v46, %v1210_v47 }
 0x2c1   : > { %v1332_v61 = vmax.f32 %v1293_v38, 0.0  ;;  %v1372_v38 = vld [vmem:[%s4576_s9] sm:$0x3] }
 0x2c4   : > { %v1179_v16 = vpop.permute.xlu1 %1178 }
 0x2c5   : > { %v1212_v59 = vadd.f32 %v1179_v16, %v3863_v21 }
 0x2c6   : > { %v1294_v62 = vpop.f32.mrf.mxu2 }
 0x2c7   : > { %v1295_v48 = vadd.f32 %v3908_v56, %v1294_v62  ;;  %v1221_v1 = vpack.c.bf16 %v1213_v8, %v1212_v59 }
 0x2c9   : > { %v1333_v39 = vmax.f32 %v1295_v48, 0.0  ;;  %2609 = vmatmul.msk.bf16.gmra.mxu3 %vm1258_vm0, %v1219_v12  ;;  %v3935_v12 = vperm.slane %v1372_v38, 1 }
 0x2cb   : > { %v1348_v40 = vpack.c.bf16 %v1333_v39, %v1332_v61 }
 0x2cd   : > { %1515 = vmatmul.bf16.vlgmr.msrb.gmra.mxu0 %v1348_v40 }
 0x2d6   : > { %v1297_v49 = vpop.f32.mrf.mxu2 }
 0x2d7   : > { %v1298_v52 = vadd.f32 %v3908_v56, %v1297_v49 }
 0x2d9   : > { %2610 = vmatmul.msk.bf16.gmra.mxu3 %vm1258_vm0, %v1220_v51  ;;  %v1334_v20 = vmax.f32 %v1298_v52, 0.0 }
 0x2de   : > { %v1299_v15 = vpop.f32.mrf.mxu2 }
 0x2df   : > { %v1300_v50 = vadd.f32 %v3908_v56, %v1299_v15 }
 0x2e1   : > { %v1335_v54 = vmax.f32 %v1300_v50, 0.0  ;;  %v3943_v50 = vperm.slane %v1372_v38, 0 }
 0x2e3   : > { %v1349_v13 = vpack.c.bf16 %v1335_v54, %v1334_v20 }
 0x2e5   : > { %1520 = vmatmul.bf16.gmra.mxu0 %v1349_v13 }
 0x2e6   : > { %v1302_v60 = vpop.f32.mrf.mxu2 }
 0x2e7   : > { %v1303_v3 = vadd.f32 %v3908_v56, %v1302_v60 }
 0x2e9   : > { %2611 = vmatmul.msk.bf16.gmra.mxu3 %vm1258_vm0, %v1221_v1  ;;  %v1336_v10 = vmax.f32 %v1303_v3, 0.0 }
 0x2ee   : > { %v1304_v5 = vpop.f32.mrf.mxu2 }
 0x2ef   : > { %v1305_v7 = vadd.f32 %v3908_v56, %v1304_v5 }
 0x2f1   : > { %v1337_v11 = vmax.f32 %v1305_v7, 0.0 }
 0x2f3   : > { %v1350_v14 = vpack.c.bf16 %v1337_v11, %v1336_v10 }
 0x2f5   : > { %1525 = vmatmul.bf16.gmra.mxu0 %v1350_v14 }
 0x2f9   : > { %1466 = vmatmul.bf16.vlgmr.msrb.gmra.mxu3 %v1348_v40 }
 0x309   : > { %1471 = vmatmul.bf16.gmra.mxu3 %v1349_v13 }
 0x319   : > { %1476 = vmatmul.bf16.gmra.mxu3 %v1350_v14 }
 0x32c   : > { %v1307_v21 = vpop.f32.mrf.mxu3 }
 0x32d   : > { %v1308_v17 = vadd.f32 %v3908_v56, %v1307_v21 }
 0x32f   : > { %v1338_v19 = vmax.f32 %v1308_v17, 0.0 }
 0x334   : > { %v1309_v29 = vpop.f32.mrf.mxu3 }
 0x335   : > { %v1310_v18 = vadd.f32 %v3908_v56, %v1309_v29 }
 0x337   : > { %v1339_v22 = vmax.f32 %v1310_v18, 0.0 }
 0x339   : > { %v1351_v23 = vpack.c.bf16 %v1339_v22, %v1338_v19 }
 0x33b   : > { %1481 = vmatmul.bf16.gmra.mxu3 %v1351_v23  ;;  %1530 = vmatmul.bf16.gmra.mxu0 %v1351_v23 }
 0x33c   : > { %v1312_v24 = vpop.f32.mrf.mxu3 }
 0x33d   : > { %v1313_v45 = vadd.f32 %v3908_v56, %v1312_v24 }
 0x33f   : > { %v1340_v27 = vmax.f32 %v1313_v45, 0.0 }
 0x344   : > { %v1314_v53 = vpop.f32.mrf.mxu3 }
 0x345   : > { %v1315_v25 = vadd.f32 %v3908_v56, %v1314_v53 }
 0x347   : > { %v1341_v28 = vmax.f32 %v1315_v25, 0.0 }
 0x349   : > { %v1352_v30 = vpack.c.bf16 %v1341_v28, %v1340_v27 }
 0x34a   : > { %v1516_v36 = vpop.f32.mrf.mxu0 }
 0x34b   : > { %1486 = vmatmul.bf16.gmra.mxu3 %v1352_v30  ;;  %1535 = vmatmul.bf16.gmra.mxu0 %v1352_v30  ;;  %v1517_v41 = vadd.f32 %v1516_v36, %v3935_v12 }
 0x34c   : > { %v1317_v31 = vpop.f32.mrf.mxu3 }
 0x34d   : > { %v1318_v55 = vadd.f32 %v3908_v56, %v1317_v31  ;;  %v2677_v43 = vmul.f32 -1.442695, %v1517_v41 }
 0x34f   : > { %v1342_v34 = vmax.f32 %v1318_v55, 0.0  ;;  %3007 = vpow2.f32 %v2677_v43 }
 0x352   : > { %v1518_v39 = vpop.f32.mrf.mxu0 }
 0x353   : > { %v1519_v44 = vadd.f32 %v1518_v39, %v3935_v12 }
 0x354   : > { %v1319_v32 = vpop.f32.mrf.mxu3 }
 0x355   : > { %v1320_v33 = vadd.f32 %v3908_v56, %v1319_v32  ;;  %v2679_v37 = vmul.f32 -1.442695, %v1519_v44  ;;  %v3008_v47 = vpop.eup %3007 }
 0x356   : > { %v3945_v16 = vadd.f32 1.0, %v3008_v47 }
 0x357   : > { %v1343_v35 = vmax.f32 %v1320_v33, 0.0  ;;  %3009 = vpow2.f32 %v2679_v37 }
 0x358   : > { %v1708_v32 = vand.u32 2147483647, %v3945_v16  ;;  %vm1704_vm1 = vweird.f32 %v3945_v16 }
 0x359   : > { %v1353_v58 = vpack.c.bf16 %v1343_v35, %v1342_v34 }
 0x35a   : > { %vm3987_vm3 = vcmp.eq.f32.partialorder %v1708_v32, 8.507059e+37 }
 0x35b   : > { %1491 = vmatmul.bf16.gmra.mxu3 %v1353_v58  ;;  %1540 = vmatmul.bf16.gmra.mxu0 %v1353_v58  ;;  %v1710_v58 = vand.u32 2147483648, %v3945_v16 }
 0x35c   : > { %v1322_v63 = vpop.f32.mrf.mxu3 }
 0x35d   : > { %v1323_v62 = vadd.f32 %v3908_v56, %v1322_v63  ;;  %v1711_v41 = vor.u32 1.1754944e-38, %v1710_v58 }
 0x35f   : > { %v1344_v40 = vmax.f32 %v1323_v62, 0.0 }
 0x362   : > { %v1521_v4 = vpop.f32.mrf.mxu0 }
 0x363   : > { %v1522_v6 = vadd.f32 %v1521_v4, %v3935_v12 }
 0x364   : > { %v1324_v48 = vpop.f32.mrf.mxu3 }
 0x365   : > { %v1325_v61 = vadd.f32 %v3908_v56, %v1324_v48  ;;  %v2681_v49 = vmul.f32 -1.442695, %v1522_v6 }
 0x367   : > { %v1345_v0 = vmax.f32 %v1325_v61, 0.0  ;;  %3011 = vpow2.f32 %v2681_v49 }
 0x368   : > { %3013 = vrcp.f32 %v3945_v16 }
 0x369   : > { %v1354_v42 = vpack.c.bf16 %v1345_v0, %v1344_v40 }
 0x36a   : > { %v1523_v15 = vpop.f32.mrf.mxu0 }
 0x36b   : > { %1496 = vmatmul.bf16.gmra.mxu3 %v1354_v42  ;;  %1545 = vmatmul.bf16.gmra.mxu0 %v1354_v42  ;;  %v1524_v13 = vadd.f32 %v1523_v15, %v3935_v12 }
 0x36c   : > { %v1327_v2 = vpop.f32.mrf.mxu3 }
 0x36d   : > { %v1328_v46 = vadd.f32 %v3908_v56, %v1327_v2  ;;  %v2683_v1 = vmul.f32 -1.442695, %v1524_v13 }
 0x36f   : > { %v1346_v51 = vmax.f32 %v1328_v46, 0.0 }
 0x372   : > { %v1526_v3 = vpop.f32.mrf.mxu0 }
 0x373   : > { %v1527_v17 = vadd.f32 %v1526_v3, %v3935_v12 }
 0x374   : > { %v1329_v26 = vpop.f32.mrf.mxu3 }
 0x375   : > { %v1330_v9 = vadd.f32 %v3908_v56, %v1329_v26  ;;  %v3010_v56 = vpop.eup %3009  ;;  %v2685_v23 = vmul.f32 -1.442695, %v1527_v17 }
 0x376   : > { %v3012_v8 = vpop.eup %3011  ;;  %v3950_v60 = vadd.f32 1.0, %v3010_v56 }
 0x377   : > { %v1347_v52 = vmax.f32 %v1330_v9, 0.0  ;;  %v3952_v5 = vpop.eup %3013  ;;  %v3954_v10 = vadd.f32 1.0, %v3012_v8 }
 0x378   : > { %v1700_v14 = vmul.f32 %v3952_v5, %v3945_v16  ;;  %vm1705_vm2 = vweird.f32 %v3952_v5  ;;  %vm1734_vm4 = vweird.f32 %v3950_v60  ;;  %v1738_v44 = vand.u32 2147483647, %v3950_v60 }
 0x379   : > { %v1355_v20 = vpack.c.bf16 %v1347_v52, %v1346_v51  ;;  %vm3999_vm5 = vmor %vm1704_vm1, %vm1705_vm2  ;;  %v1740_v16 = vand.u32 2147483648, %v3950_v60  ;;  %vm1764_vm2 = vweird.f32 %v3954_v10  ;;  %v1770_v61 = vand.u32 2147483648, %v3954_v10 }
 0x37a   : > { %v1701_v19 = vsub.f32 1.0, %v1700_v14  ;;  %v1528_v53 = vpop.f32.mrf.mxu0  ;;  %vm4023_vm11 = vcmp.eq.f32.partialorder %v1738_v44, 8.507059e+37 }
 0x37b   : > { %1501 = vmatmul.bf16.gmra.mxu3 %v1355_v20  ;;  %1550 = vmatmul.bf16.gmra.mxu0 %v1355_v20  ;;  %v1529_v34 = vadd.f32 %v1528_v53, %v3935_v12 }
 0x37c   : > { %v1467_v54 = vpop.f32.mrf.mxu3  ;;  %v1702_v28 = vmul.f32 %v3952_v5, %v1701_v19 }
 0x37d   : > { %v1468_v57 = vadd.f32 %v1467_v54, %v3943_v50  ;;  %v2687_v39 = vmul.f32 -1.442695, %v1529_v34 }
 0x37e   : > { %v1703_v38 = vadd.f32 %v3952_v5, %v1702_v28 }
 0x37f   : > { %v2676_v59 = vmul.f32 -1.442695, %v1468_v57 }
 0x380   : > { %v1707_v37 = vsel %vm3999_vm5, %v3952_v5, %v1703_v38 }
 0x381   : > { %3015 = vpow2.f32 %v2676_v59  ;;  %v1712_v59 = vsel %vm3987_vm3, %v1711_v41, %v1707_v37 }
 0x382   : > { %3017 = vrcp.f32 %v3950_v60 }
 0x383   : > { %3019 = vpow2.f32 %v2683_v1 }
 0x384   : > { %v1469_v7 = vpop.f32.mrf.mxu3  ;;  %3021 = vrcp.f32 %v3954_v10 }
 0x385   : > { %v1470_v11 = vadd.f32 %v1469_v7, %v3943_v50 }
 0x387   : > { %v3016_v21 = vpop.eup %3015  ;;  %v2678_v29 = vmul.f32 -1.442695, %v1470_v11 }
 0x388   : > { %v3962_v18 = vadd.f32 1.0, %v3016_v21  ;;  %v3965_v22 = vpop.eup %3017  ;;  %v1741_v21 = vor.u32 1.1754944e-38, %v1740_v16 }
 0x389   : > { %3023 = vpow2.f32 %v2678_v29  ;;  %v3020_v45 = vpop.eup %3019  ;;  %v1730_v30 = vmul.f32 %v3965_v22, %v3950_v60  ;;  %vm1735_vm10 = vweird.f32 %v3965_v22  ;;  %v1768_v60 = vand.u32 2147483647, %v3954_v10 }
 0x38a   : > { %3025 = vrcp.f32 %v3962_v18  ;;  %v3968_v27 = vpop.eup %3021  ;;  %v3974_v33 = vadd.f32 1.0, %v3020_v45  ;;  %v1695_v42 = vand.u32 2147483648, %v3962_v18  ;;  %v1693_v46 = vand.u32 2147483647, %v3962_v18  ;;  %vm4034_vm12 = vmor %vm1734_vm4, %vm1735_vm10 }
 0x38b   : > { %3027 = vpow2.f32 %v2685_v23  ;;  %v1731_v62 = vsub.f32 1.0, %v1730_v30  ;;  %v1760_v48 = vmul.f32 %v3968_v27, %v3954_v10  ;;  %vm1689_vm7 = vweird.f32 %v3962_v18 }
 0x38c   : > { %v1472_v24 = vpop.f32.mrf.mxu3  ;;  %v1696_v54 = vor.u32 1.1754944e-38, %v1695_v42  ;;  %vm1694_vm9 = vcmp.eq.f32.partialorder %v1693_v46, 8.507059e+37  ;;  %vm1765_vm14 = vweird.f32 %v3968_v27  ;;  %vm4075_vm5 = vcmp.eq.f32.partialorder %v1768_v60, 8.507059e+37 }
 0x38d   : > { %v1473_v25 = vadd.f32 %v1472_v24, %v3943_v50  ;;  %v1732_v9 = vmul.f32 %v3965_v22, %v1731_v62  ;;  %v1761_v47 = vsub.f32 1.0, %v1760_v48  ;;  %vm4066_vm3 = vmor %vm1764_vm2, %vm1765_vm14  ;;  %vm1794_vm10 = vweird.f32 %v3974_v33 }
 0x38f   : > { %v2680_v31 = vmul.f32 -1.442695, %v1473_v25  ;;  %v3024_v55 = vpop.eup %3023  ;;  %v1733_v8 = vadd.f32 %v3965_v22, %v1732_v9  ;;  %v1762_v5 = vmul.f32 %v3968_v27, %v1761_v47  ;;  %v1771_v47 = vor.u32 1.1754944e-38, %v1770_v61 }
 0x390   : > { %v3026_v35 = vpop.eup %3025  ;;  %v3978_v63 = vadd.f32 1.0, %v3024_v55 }
 0x391   : > { %3029 = vpow2.f32 %v2680_v31  ;;  %v1685_v36 = vmul.f32 %v3026_v35, %v3962_v18  ;;  %v3028_v43 = vpop.eup %3027  ;;  %vm1690_vm6 = vweird.f32 %v3026_v35  ;;  %v1737_v25 = vsel %vm4034_vm12, %v3965_v22, %v1733_v8 }
 0x392   : > { %3031 = vrcp.f32 %v3978_v63  ;;  %v4013_v20 = vadd.f32 1.0, %v3028_v43  ;;  %vm1691_vm8 = vmor %vm1689_vm7, %vm1690_vm6  ;;  %v1725_v29 = vand.u32 2147483648, %v3978_v63  ;;  %v1723_v45 = vand.u32 2147483647, %v3978_v63 }
 0x393   : > { %3033 = vrcp.f32 %v3974_v33  ;;  %v1686_v40 = vsub.f32 1.0, %v1685_v36  ;;  %v1763_v31 = vadd.f32 %v3968_v27, %v1762_v5  ;;  %vm1719_vm15 = vweird.f32 %v3978_v63 }
 0x394   : > { %v1474_v0 = vpop.f32.mrf.mxu3  ;;  %3035 = vpow2.f32 %v2687_v39  ;;  %vm1724_vm1 = vcmp.eq.f32.partialorder %v1723_v45, 8.507059e+37  ;;  %v1742_v38 = vsel %vm4023_vm11, %v1741_v21, %v1737_v25  ;;  %vm1824_vm2 = vweird.f32 %v4013_v20 }
 0x395   : > { %v1475_v2 = vadd.f32 %v1474_v0, %v3943_v50  ;;  %v1687_v6 = vmul.f32 %v3026_v35, %v1686_v40  ;;  %v1767_v10 = vsel %vm4066_vm3, %v3968_v27, %v1763_v31 }
 0x396   : > { %v1772_v16 = vsel %vm4075_vm5, %v1771_v47, %v1767_v10 }
 0x397   : > { %v3030_v26 = vpop.eup %3029  ;;  %v2682_v49 = vmul.f32 -1.442695, %v1475_v2  ;;  %v1688_v51 = vadd.f32 %v3026_v35, %v1687_v6 }
 0x398   : > { %v4010_v52 = vadd.f32 1.0, %v3030_v26  ;;  %v3032_v15 = vpop.eup %3031 }
 0x399   : > { %3037 = vpow2.f32 %v2682_v49  ;;  %v4015_v57 = vpop.eup %3033  ;;  %v1692_v56 = vsel %vm1691_vm8, %v3026_v35, %v1688_v51  ;;  %v1715_v13 = vmul.f32 %v3032_v15, %v3978_v63  ;;  %vm1720_vm13 = vweird.f32 %v3032_v15 }
 0x39a   : > { %3039 = vrcp.f32 %v4010_v52  ;;  %v1697_v1 = vsel %vm1694_vm9, %v1696_v54, %v1692_v56  ;;  %v1790_v17 = vmul.f32 %v4015_v57, %v3974_v33  ;;  %v3036_v19 = vpop.eup %3035  ;;  %vm1721_vm0 = vmor %vm1719_vm15, %vm1720_vm13  ;;  %v1726_v35 = vor.u32 1.1754944e-38, %v1725_v29 }
 0x39b   : > { %v2164_v7 = vpack.c.bf16 %v1712_v59, %v1697_v1  ;;  %v1716_v11 = vsub.f32 1.0, %v1715_v13  ;;  %3041 = vrcp.f32 %v4013_v20  ;;  %v4054_v22 = vadd.f32 1.0, %v3036_v19 }
 0x39c   : > { %v1477_v14 = vpop.f32.mrf.mxu3  ;;  %v1791_v34 = vsub.f32 1.0, %v1790_v17  ;;  %v1755_v40 = vand.u32 2147483648, %v4010_v52  ;;  %v1753_v2 = vand.u32 2147483647, %v4010_v52  ;;  %vm1749_vm6 = vweird.f32 %v4010_v52 }
 0x39d   : > { %v1478_v18 = vadd.f32 %v1477_v14, %v3943_v50  ;;  %2180 = vst [vmem:[%s4040_s29] sm:$0xff] %v2164_v7  ;;  %v1717_v24 = vmul.f32 %v3032_v15, %v1716_v11  ;;  %vm1795_vm7 = vweird.f32 %v4015_v57  ;;  %v1800_v1 = vand.u32 2147483648, %v3974_v33 }
 0x39e   : > { %v1792_v44 = vmul.f32 %v4015_v57, %v1791_v34  ;;  %v1756_v27 = vor.u32 1.1754944e-38, %v1755_v40  ;;  %vm1754_vm9 = vcmp.eq.f32.partialorder %v1753_v2, 8.507059e+37  ;;  %vm4101_vm11 = vmor %vm1794_vm10, %vm1795_vm7  ;;  %v1798_v7 = vand.u32 2147483647, %v3974_v33 }
 0x39f   : > { %v3038_v53 = vpop.eup %3037  ;;  %v2684_v28 = vmul.f32 -1.442695, %v1478_v18  ;;  %v1718_v55 = vadd.f32 %v3032_v15, %v1717_v24  ;;  %v1801_v23 = vor.u32 1.1754944e-38, %v1800_v1  ;;  %v1830_v34 = vand.u32 2147483648, %v4013_v20 }
 0x3a0   : > { %v3040_v30 = vpop.eup %3039  ;;  %v4051_v32 = vadd.f32 1.0, %v3038_v53  ;;  %vm1799_vm15 = vcmp.eq.f32.partialorder %v1798_v7, 8.507059e+37 }
 0x3a1   : > { %v1745_v58 = vmul.f32 %v3040_v30, %v4010_v52  ;;  %3043 = vpow2.f32 %v2684_v28  ;;  %v1722_v36 = vsel %vm1721_vm0, %v3032_v15, %v1718_v55  ;;  %v4059_v63 = vpop.eup %3041  ;;  %vm1750_vm4 = vweird.f32 %v3040_v30 }
 0x3a2   : > { %3045 = vrcp.f32 %v4051_v32  ;;  %v1727_v62 = vsel %vm1724_vm1, %v1726_v35, %v1722_v36  ;;  %v1820_v46 = vmul.f32 %v4059_v63, %v4013_v20  ;;  %vm1751_vm8 = vmor %vm1749_vm6, %vm1750_vm4  ;;  %v1793_v52 = vadd.f32 %v4015_v57, %v1792_v44 }
 0x3a3   : > { %v1746_v48 = vsub.f32 1.0, %v1745_v58  ;;  %v2165_v39 = vpack.c.bf16 %v1742_v38, %v1727_v62  ;;  %3047 = vrcp.f32 %v4054_v22  ;;  %v1785_v3 = vand.u32 2147483648, %v4051_v32 }
 0x3a4   : > { %v1479_v0 = vpop.f32.mrf.mxu3  ;;  %v1821_v56 = vsub.f32 1.0, %v1820_v46  ;;  %v1783_v14 = vand.u32 2147483647, %v4051_v32  ;;  %v1797_v21 = vsel %vm4101_vm11, %v4015_v57, %v1793_v52  ;;  %vm1779_vm13 = vweird.f32 %v4051_v32 }
 0x3a5   : > { %v1747_v42 = vmul.f32 %v3040_v30, %v1746_v48  ;;  %v1480_v43 = vadd.f32 %v1479_v0, %v3943_v50  ;;  %2181 = vst [vmem:[%s4040_s29 + $0x8] sm:$0xff] %v2165_v39  ;;  %v1786_v24 = vor.u32 1.1754944e-38, %v1785_v3  ;;  %v1802_v25 = vsel %vm1799_vm15, %v1801_v23, %v1797_v21 }
 0x3a6   : > { %v1822_v29 = vmul.f32 %v4059_v63, %v1821_v56  ;;  %vm1784_vm0 = vcmp.eq.f32.partialorder %v1783_v14, 8.507059e+37  ;;  %vm1825_vm1 = vweird.f32 %v4059_v63 }
 0x3a7   : > { %v3044_v6 = vpop.eup %3043  ;;  %v1748_v26 = vadd.f32 %v3040_v30, %v1747_v42  ;;  %v2686_v37 = vmul.f32 -1.442695, %v1480_v43  ;;  %vm4143_vm4 = vmor %vm1824_vm2, %vm1825_vm1 }
 0x3a8   : > { %v3046_v9 = vpop.eup %3045  ;;  %v4087_v49 = vadd.f32 1.0, %v3044_v6  ;;  %v1823_v28 = vadd.f32 %v4059_v63, %v1822_v29 }
 0x3a9   : > { %v1752_v51 = vsel %vm1751_vm8, %v3040_v30, %v1748_v26  ;;  %v1775_v15 = vmul.f32 %v3046_v9, %v4051_v32  ;;  %3049 = vpow2.f32 %v2686_v37  ;;  %v4094_v8 = vpop.eup %3047  ;;  %vm1780_vm12 = vweird.f32 %v3046_v9 }
 0x3aa   : > { %v1757_v54 = vsel %vm1754_vm9, %v1756_v27, %v1752_v51  ;;  %3051 = vrcp.f32 %v4087_v49  ;;  %v1850_v18 = vmul.f32 %v4094_v8, %v4054_v22  ;;  %vm1781_vm14 = vmor %vm1779_vm13, %vm1780_vm12  ;;  %v1828_v32 = vand.u32 2147483647, %v4013_v20 }
 0x3ab   : > { %v2166_v13 = vpack.c.bf16 %v1772_v16, %v1757_v54  ;;  %v1776_v59 = vsub.f32 1.0, %v1775_v15  ;;  %v1815_v35 = vand.u32 2147483648, %v4087_v49  ;;  %v1813_v36 = vand.u32 2147483647, %v4087_v49 }
 0x3ac   : > { %v1851_v30 = vsub.f32 1.0, %v1850_v18 }
 0x3ad   : > { %2182 = vst [vmem:[%s4040_s29 + $0x10] sm:$0xff] %v2166_v13  ;;  %v1777_v11 = vmul.f32 %v3046_v9, %v1776_v59 }
 0x3af   : > { %v3050_v17 = vpop.eup %3049  ;;  %v1778_v19 = vadd.f32 %v3046_v9, %v1777_v11 }
 0x3b0   : > { %v4116_v33 = vpop.eup %3051  ;;  %v4118_v45 = vadd.f32 1.0, %v3050_v17 }
 0x3b1   : > { %v1782_v57 = vsel %vm1781_vm14, %v3046_v9, %v1778_v19  ;;  %v1805_v53 = vmul.f32 %v4116_v33, %v4087_v49  ;;  %vm1810_vm3 = vweird.f32 %v4116_v33 }
 0x3b2   : > { %v1787_v60 = vsel %vm1784_vm0, %v1786_v24, %v1782_v57  ;;  %3053 = vrcp.f32 %v4118_v45 }
 0x3b3   : > { %v2167_v31 = vpack.c.bf16 %v1802_v25, %v1787_v60  ;;  %v1806_v55 = vsub.f32 1.0, %v1805_v53 }
 0x3b5   : > { %2183 = vst [vmem:[%s4040_s29 + $0x18] sm:$0xff] %v2167_v31  ;;  %v1807_v58 = vmul.f32 %v4116_v33, %v1806_v55 }
 0x3b6   : > { %3312 = shalt.err (!%p3309_p12)
}
 0x3b7   : > { %s3402_s5 = smov 128   ;;  %s3403_s28 = smov 8   ;;  %v1827_v20 = vsel %vm4143_vm4, %v4059_v63, %v1823_v28  ;;  %v1852_v62 = vmul.f32 %v4094_v8, %v1851_v30  ;;  %v1808_v48 = vadd.f32 %v4116_v33, %v1807_v58  ;;  %vm1809_vm5 = vweird.f32 %v4087_v49 }
 0x3b8   : > { %2852 = dma.vmem_to_hbm [thread:$0]  (%p3554_p5), %s4131_s27, 2048, %s2251_s25, %s2218_s23, %s3402_s5, %s3402_s5, %s3403_s28   ;;  %v3054_v61 = vpop.eup %3053  ;;  %vm1829_vm6 = vcmp.eq.f32.partialorder %v1828_v32, 8.507059e+37  ;;  %v1831_v39 = vor.u32 1.1754944e-38, %v1830_v34  ;;  %vm1811_vm7 = vmor %vm1809_vm5, %vm1810_vm3  ;;  %v1816_v40 = vor.u32 1.1754944e-38, %v1815_v35  ;;  %v1531_v0 = vpop.f32.mrf.mxu0  ;;  %vm1814_vm8 = vcmp.eq.f32.partialorder %v1813_v36, 8.507059e+37 }
 0x3b9   : > { %v1812_v41 = vsel %vm1811_vm7, %v4116_v33, %v1808_v48  ;;  %v1835_v63 = vmul.f32 %v3054_v61, %v4118_v45  ;;  %v1532_v42 = vadd.f32 %v1531_v0, %v3935_v12  ;;  %vm1855_vm9 = vweird.f32 %v4094_v8  ;;  %s2230_s23 = scalar_lea.hbm %s4577_s10, %s2780_s8  ;;  %s2231_s21 = sshll.u32 %s4040_s29, 4  ;;  %s2232_s21 = int_to_ptr.vmem [resolvable:$true] %s2231_s21 }
 0x3ba   : > { %v1832_v2 = vsel %vm1829_vm6, %v1831_v39, %v1827_v20  ;;  %v1817_v43 = vsel %vm1814_vm8, %v1816_v40, %v1812_v41  ;;  %v1853_v10 = vadd.f32 %v4094_v8, %v1852_v62  ;;  %vm1854_vm10 = vweird.f32 %v4054_v22  ;;  %s2233_s26 = sshll.u32 %s2230_s23, 4  ;;  %s2213_s8 = scalar_lea.sflag [#allocation4], %s3584_s6  ;;  %s2234_s26 = int_to_ptr.hbm [resolvable:$true] %s2233_s26 }
 0x3bb   : > { %v2168_v4 = vpack.c.bf16 %v1832_v2, %v1817_v43  ;;  %v1836_v44 = vsub.f32 1.0, %v1835_v63  ;;  %v2689_v6 = vmul.f32 -1.442695, %v1532_v42  ;;  %v1858_v46 = vand.u32 2147483647, %v4054_v22  ;;  %vm4183_vm12 = vmor %vm1854_vm10, %vm1855_vm9  ;;  %s3327_s12 = sshra.s32 %s2234_s26, 4  ;;  %s3328_s12 = int_to_ptr.hbm [resolvable:$true] %s3327_s12 }
 0x3bc   : > { %v1860_v26 = vand.u32 2147483648, %v4054_v22  ;;  %v1845_v37 = vand.u32 2147483648, %v4118_v45  ;;  %vm1840_vm11 = vweird.f32 %v3054_v61  ;;  %v1843_v47 = vand.u32 2147483647, %v4118_v45  ;;  %s3329_s30 = scalar_lea.hbm %s3328_s12, 128  ;;  %s3333_s15 = scalar_lea.hbm %s4577_s10, 256 }
 0x3bd   : > { %2184 = vst [vmem:[%s4040_s29 + $0x20] sm:$0xff] %v2168_v4  ;;  %v1837_v9 = vmul.f32 %v3054_v61, %v1836_v44  ;;  %3055 = vpow2.f32 %v2689_v6  ;;  %v1857_v51 = vsel %vm4183_vm12, %v4094_v8, %v1853_v10  ;;  %vm1839_vm13 = vweird.f32 %v4118_v45  ;;  %p3330_p13 = scmp.ne.s32.totalorder %s3328_s12, %s3329_s30  ;;  %p3334_p7 = scmp.lt.s32.totalorder %s3328_s12, %s4577_s10 }
 0x3be   : > { %v1482_v49 = vpop.f32.mrf.mxu3  ;;  %vm1859_vm14 = vcmp.eq.f32.partialorder %v1858_v46, 8.507059e+37  ;;  %v1861_v16 = vor.u32 1.1754944e-38, %v1860_v26  ;;  %vm1841_vm15 = vmor %vm1839_vm13, %vm1840_vm11  ;;  %v1846_v52 = vor.u32 1.1754944e-38, %v1845_v37  ;;  %vm1844_vm0 = vcmp.eq.f32.partialorder %v1843_v47, 8.507059e+37  ;;  %p3335_p1 = scmp.lt.s32.totalorder %s3333_s15, %s3329_s30 }
 0x3bf   : > { %v1838_v22 = vadd.f32 %v3054_v61, %v1837_v9  ;;  %v1483_v15 = vadd.f32 %v1482_v49, %v3943_v50  ;;  %p3331_p0 = pnand %p3330_p13, %p3554_p5 }
 0x3c0   : > { %v1533_v54 = vpop.f32.mrf.mxu0  ;;  %v1862_v1 = vsel %vm1859_vm14, %v1861_v16, %v1857_v51  ;;  %p3336_p4 = por %p3335_p1, %p3334_p7 }
 0x3c1   : > { %v1842_v56 = vsel %vm1841_vm15, %v3054_v61, %v1838_v22  ;;  %v2688_v13 = vmul.f32 -1.442695, %v1483_v15  ;;  %v1534_v59 = vadd.f32 %v1533_v54, %v3935_v12  ;;  %p3332_p3 = pneg %p3331_p0 }
 0x3c2   : > { %v1847_v3 = vsel %vm1844_vm0, %v1846_v52, %v1842_v56 }
 0x3c3   : > { %v3056_v5 = vpop.eup %3055  ;;  %v2169_v8 = vpack.c.bf16 %v1862_v1, %v1847_v3  ;;  %3057 = vpow2.f32 %v2688_v13  ;;  %v2691_v7 = vmul.f32 -1.442695, %v1534_v59  ;;  %p3337_p8 = pnand %p3336_p4, %p3332_p3 }
 0x3c4   : > { %v1665_v11 = vadd.f32 1.0, %v3056_v5 }
 0x3c5   : > { %2185 = vst [vmem:[%s4040_s29 + $0x28] sm:$0xff] %v2169_v8  ;;  %3059 = vpow2.f32 %v2691_v7 }
 0x3c6   : > { %3061 = vrcp.f32 %v1665_v11  ;;  %v1484_v14 = vpop.f32.mrf.mxu3  ;;  %v1888_v35 = vand.u32 2147483647, %v1665_v11  ;;  %vm1884_vm1 = vweird.f32 %v1665_v11  ;;  %v1890_v48 = vand.u32 2147483648, %v1665_v11 }
 0x3c7   : > { %v1485_v21 = vadd.f32 %v1484_v14, %v3943_v50 }
 0x3c8   : > { %v1536_v17 = vpop.f32.mrf.mxu0  ;;  %vm4212_vm4 = vcmp.eq.f32.partialorder %v1888_v35, 8.507059e+37  ;;  %v1891_v6 = vor.u32 1.1754944e-38, %v1890_v48 }
 0x3c9   : > { %v3058_v29 = vpop.eup %3057  ;;  %v2690_v18 = vmul.f32 -1.442695, %v1485_v21  ;;  %v1537_v19 = vadd.f32 %v1536_v17, %v3935_v12 }
 0x3ca   : > { %v1664_v33 = vadd.f32 1.0, %v3058_v29 }
 0x3cb   : > { %v3060_v23 = vpop.eup %3059  ;;  %3063 = vpow2.f32 %v2690_v18  ;;  %v2693_v24 = vmul.f32 -1.442695, %v1537_v19 }
 0x3cc   : > { %v3062_v45 = vpop.eup %3061  ;;  %3065 = vrcp.f32 %v1664_v33  ;;  %v4196_v53 = vadd.f32 1.0, %v3060_v23  ;;  %v1873_v61 = vand.u32 2147483647, %v1664_v33  ;;  %v1875_v41 = vand.u32 2147483648, %v1664_v33 }
 0x3cd   : > { %v1880_v57 = vmul.f32 %v3062_v45, %v1665_v11  ;;  %3067 = vpow2.f32 %v2693_v24  ;;  %vm1885_vm2 = vweird.f32 %v3062_v45  ;;  %vm1869_vm6 = vweird.f32 %v1664_v33 }
 0x3ce   : > { %v1487_v25 = vpop.f32.mrf.mxu3  ;;  %3069 = vrcp.f32 %v4196_v53  ;;  %vm4208_vm3 = vmor %vm1884_vm1, %vm1885_vm2  ;;  %vm1874_vm7 = vcmp.eq.f32.partialorder %v1873_v61, 8.507059e+37  ;;  %v1876_v37 = vor.u32 1.1754944e-38, %v1875_v41  ;;  %vm1914_vm9 = vweird.f32 %v4196_v53 }
 0x3cf   : > { %v1881_v60 = vsub.f32 1.0, %v1880_v57  ;;  %v1488_v28 = vadd.f32 %v1487_v25, %v3943_v50  ;;  %v1920_v8 = vand.u32 2147483648, %v4196_v53  ;;  %v1918_v14 = vand.u32 2147483647, %v4196_v53 }
 0x3d0   : > { %v1538_v30 = vpop.f32.mrf.mxu0 }
 0x3d1   : > { %v3064_v31 = vpop.eup %3063  ;;  %v1882_v55 = vmul.f32 %v3062_v45, %v1881_v60  ;;  %v1539_v32 = vadd.f32 %v1538_v30, %v3935_v12  ;;  %v2692_v36 = vmul.f32 -1.442695, %v1488_v28  ;;  %v1921_v57 = vor.u32 1.1754944e-38, %v1920_v8 }
 0x3d2   : > { %v3066_v34 = vpop.eup %3065  ;;  %v4201_v58 = vadd.f32 1.0, %v3064_v31  ;;  %vm1919_vm14 = vcmp.eq.f32.partialorder %v1918_v14, 8.507059e+37 }
 0x3d3   : > { %v3068_v38 = vpop.eup %3067  ;;  %v1883_v20 = vadd.f32 %v3062_v45, %v1882_v55  ;;  %v1865_v62 = vmul.f32 %v3066_v34, %v1664_v33  ;;  %v2695_v39 = vmul.f32 -1.442695, %v1539_v32  ;;  %vm1870_vm5 = vweird.f32 %v3066_v34 }
 0x3d4   : > { %3071 = vrcp.f32 %v4201_v58  ;;  %v4204_v40 = vpop.eup %3069  ;;  %v4206_v63 = vadd.f32 1.0, %v3068_v38  ;;  %vm1871_vm8 = vmor %vm1869_vm6, %vm1870_vm5  ;;  %v1905_v21 = vand.u32 2147483648, %v4201_v58  ;;  %v1903_v19 = vand.u32 2147483647, %v4201_v58 }
 0x3d5   : > { %v1866_v0 = vsub.f32 1.0, %v1865_v62  ;;  %3073 = vpow2.f32 %v2692_v36  ;;  %v1910_v43 = vmul.f32 %v4204_v40, %v4196_v53  ;;  %v1887_v4 = vsel %vm4208_vm3, %v3062_v45, %v1883_v20 }
 0x3d6   : > { %v1489_v10 = vpop.f32.mrf.mxu3  ;;  %3075 = vrcp.f32 %v4206_v63  ;;  %v1892_v49 = vsel %vm4212_vm4, %v1891_v6, %v1887_v4  ;;  %vm1915_vm10 = vweird.f32 %v4204_v40  ;;  %vm1899_vm13 = vweird.f32 %v4201_v58 }
 0x3d7   : > { %v1867_v44 = vmul.f32 %v3066_v34, %v1866_v0  ;;  %v1911_v46 = vsub.f32 1.0, %v1910_v43  ;;  %3077 = vpow2.f32 %v2695_v39  ;;  %v1490_v9 = vadd.f32 %v1489_v10, %v3943_v50  ;;  %vm4245_vm11 = vmor %vm1914_vm9, %vm1915_vm10 }
 0x3d8   : > { %v1541_v47 = vpop.f32.mrf.mxu0  ;;  %v1906_v28 = vor.u32 1.1754944e-38, %v1905_v21  ;;  %vm1904_vm0 = vcmp.eq.f32.partialorder %v1903_v19, 8.507059e+37  ;;  %v1950_v48 = vand.u32 2147483648, %v4206_v63  ;;  %vm1944_vm2 = vweird.f32 %v4206_v63 }
 0x3d9   : > { %v1868_v26 = vadd.f32 %v3066_v34, %v1867_v44  ;;  %v1912_v51 = vmul.f32 %v4204_v40, %v1911_v46  ;;  %v1542_v22 = vadd.f32 %v1541_v47, %v3935_v12  ;;  %v2694_v54 = vmul.f32 -1.442695, %v1490_v9 }
 0x3da   : > { %v3072_v27 = vpop.eup %3071 }
 0x3db   : > { %v3074_v15 = vpop.eup %3073  ;;  %v1872_v16 = vsel %vm1871_vm8, %v3066_v34, %v1868_v26  ;;  %v1895_v52 = vmul.f32 %v3072_v27, %v4201_v58  ;;  %v1913_v13 = vadd.f32 %v4204_v40, %v1912_v51  ;;  %v2697_v1 = vmul.f32 -1.442695, %v1542_v22 }
 0x3dc   : > { %v1877_v56 = vsel %vm1874_vm7, %v1876_v37, %v1872_v16  ;;  %v4230_v59 = vadd.f32 1.0, %v3074_v15  ;;  %v4232_v3 = vpop.eup %3075  ;;  %3079 = vpow2.f32 %v2694_v54  ;;  %vm1900_vm12 = vweird.f32 %v3072_v27 }
 0x3dd   : > { %v2170_v5 = vpack.c.bf16 %v1892_v49, %v1877_v56  ;;  %v1896_v7 = vsub.f32 1.0, %v1895_v52  ;;  %v3078_v11 = vpop.eup %3077  ;;  %v1940_v17 = vmul.f32 %v4232_v3, %v4206_v63  ;;  %v1917_v23 = vsel %vm4245_vm11, %v4204_v40, %v1913_v13  ;;  %vm1901_vm15 = vmor %vm1899_vm13, %vm1900_vm12 }
 0x3de   : > { %3081 = vrcp.f32 %v4230_v59  ;;  %v1492_v33 = vpop.f32.mrf.mxu3  ;;  %v4253_v45 = vadd.f32 1.0, %v3078_v11  ;;  %v1922_v55 = vsel %vm1919_vm14, %v1921_v57, %v1917_v23  ;;  %v1948_v34 = vand.u32 2147483647, %v4206_v63 }
 0x3df   : > { %2186 = vst [vmem:[%s4040_s29 + $0x30] sm:$0xff] %v2170_v5  ;;  %v1897_v18 = vmul.f32 %v3072_v27, %v1896_v7  ;;  %v1941_v24 = vsub.f32 1.0, %v1940_v17  ;;  %3083 = vpow2.f32 %v2697_v1  ;;  %v1493_v53 = vadd.f32 %v1492_v33, %v3943_v50 }
 0x3e0   : > { %v1543_v60 = vpop.f32.mrf.mxu0  ;;  %3085 = vrcp.f32 %v4253_v45  ;;  %vm1945_vm1 = vweird.f32 %v4232_v3  ;;  %v1933_v0 = vand.u32 2147483647, %v4230_v59  ;;  %vm4271_vm3 = vcmp.eq.f32.partialorder %v1948_v34, 8.507059e+37 }
 0x3e1   : > { %v1898_v25 = vadd.f32 %v3072_v27, %v1897_v18  ;;  %v1942_v30 = vmul.f32 %v4232_v3, %v1941_v24  ;;  %v2696_v38 = vmul.f32 -1.442695, %v1493_v53  ;;  %v1544_v20 = vadd.f32 %v1543_v60, %v3935_v12  ;;  %vm4281_vm4 = vmor %vm1944_vm2, %vm1945_vm1 }
 0x3e2   : > { %v3080_v31 = vpop.eup %3079  ;;  %v1935_v2 = vand.u32 2147483648, %v4230_v59  ;;  %v1951_v63 = vor.u32 1.1754944e-38, %v1950_v48  ;;  %vm1929_vm6 = vweird.f32 %v4230_v59  ;;  %vm4291_vm7 = vcmp.eq.f32.partialorder %v1933_v0, 8.507059e+37 }
 0x3e3   : > { %v1902_v32 = vsel %vm1901_vm15, %v3072_v27, %v1898_v25  ;;  %v4260_v58 = vadd.f32 1.0, %v3080_v31  ;;  %v1943_v40 = vadd.f32 %v4232_v3, %v1942_v30  ;;  %v2699_v44 = vmul.f32 -1.442695, %v1544_v20 }
 0x3e4   : > { %v3082_v35 = vpop.eup %3081  ;;  %v1907_v36 = vsel %vm1904_vm0, %v1906_v28, %v1902_v32  ;;  %v1936_v51 = vor.u32 1.1754944e-38, %v1935_v2  ;;  %v1978_v16 = vand.u32 2147483647, %v4253_v45  ;;  %v1980_v52 = vand.u32 2147483648, %v4253_v45 }
 0x3e5   : > { %v2171_v62 = vpack.c.bf16 %v1922_v55, %v1907_v36  ;;  %v1925_v61 = vmul.f32 %v3082_v35, %v4230_v59  ;;  %v3084_v39 = vpop.eup %3083  ;;  %3087 = vrcp.f32 %v4260_v58  ;;  %vm1930_vm5 = vweird.f32 %v3082_v35 }
 0x3e6   : > { %v1494_v43 = vpop.f32.mrf.mxu3  ;;  %v4276_v10 = vpop.eup %3085  ;;  %v4278_v4 = vadd.f32 1.0, %v3084_v39  ;;  %3089 = vpow2.f32 %v2696_v38  ;;  %v1947_v47 = vsel %vm4281_vm4, %v4232_v3, %v1943_v40  ;;  %vm1931_vm8 = vmor %vm1929_vm6, %vm1930_vm5  ;;  %v1963_v19 = vand.u32 2147483647, %v4260_v58 }
 0x3e7   : > { %2187 = vst [vmem:[%s4040_s29 + $0x38] sm:$0xff] %v2171_v62  ;;  %v1926_v42 = vsub.f32 1.0, %v1925_v61  ;;  %v1495_v6 = vadd.f32 %v1494_v43, %v3943_v50  ;;  %v1970_v37 = vmul.f32 %v4276_v10, %v4253_v45  ;;  %v1952_v13 = vsel %vm4271_vm3, %v1951_v63, %v1947_v47 }
 0x3e8   : > { %v1546_v9 = vpop.f32.mrf.mxu0  ;;  %3091 = vrcp.f32 %v4278_v4  ;;  %vm1975_vm9 = vweird.f32 %v4276_v10  ;;  %v1965_v33 = vand.u32 2147483648, %v4260_v58  ;;  %vm1974_vm10 = vweird.f32 %v4253_v45 }
 0x3e9   : > { %v1927_v26 = vmul.f32 %v3082_v35, %v1926_v42  ;;  %v1971_v22 = vsub.f32 1.0, %v1970_v37  ;;  %3093 = vpow2.f32 %v2699_v44  ;;  %v2698_v54 = vmul.f32 -1.442695, %v1495_v6  ;;  %vm4320_vm12 = vmor %vm1974_vm10, %vm1975_vm9 }
 0x3ea   : > { %v1547_v56 = vadd.f32 %v1546_v9, %v3935_v12  ;;  %vm4324_vm13 = vcmp.eq.f32.partialorder %v1978_v16, 8.507059e+37  ;;  %vm1959_vm14 = vweird.f32 %v4260_v58  ;;  %v1981_v34 = vor.u32 1.1754944e-38, %v1980_v52 }
 0x3eb   : > { %v1928_v49 = vadd.f32 %v3082_v35, %v1927_v26  ;;  %v3088_v15 = vpop.eup %3087  ;;  %v1972_v1 = vmul.f32 %v4276_v10, %v1971_v22  ;;  %3095 = vpow2.f32 %v2698_v54  ;;  %vm1964_vm0 = vcmp.eq.f32.partialorder %v1963_v19, 8.507059e+37 }
 0x3ec   : > { %v1955_v3 = vmul.f32 %v3088_v15, %v4260_v58  ;;  %v3090_v5 = vpop.eup %3089  ;;  %v2701_v7 = vmul.f32 -1.442695, %v1547_v56  ;;  %vm1960_vm11 = vweird.f32 %v3088_v15  ;;  %v2008_v40 = vand.u32 2147483647, %v4278_v4 }
 0x3ed   : > { %v1932_v59 = vsel %vm1931_vm8, %v3082_v35, %v1928_v49  ;;  %v1973_v14 = vadd.f32 %v4276_v10, %v1972_v1  ;;  %v4307_v17 = vadd.f32 1.0, %v3090_v5  ;;  %vm1961_vm15 = vmor %vm1959_vm14, %vm1960_vm11  ;;  %v1966_v35 = vor.u32 1.1754944e-38, %v1965_v33 }
 0x3ee   : > { %v1937_v8 = vsel %vm4291_vm7, %v1936_v51, %v1932_v59  ;;  %v1956_v21 = vsub.f32 1.0, %v1955_v3  ;;  %v1497_v29 = vpop.f32.mrf.mxu3  ;;  %v4309_v18 = vpop.eup %3091  ;;  %3097 = vpow2.f32 %v2701_v7  ;;  %v2010_v43 = vand.u32 2147483648, %v4278_v4 }
 0x3ef   : > { %v2172_v11 = vpack.c.bf16 %v1952_v13, %v1937_v8  ;;  %v1498_v23 = vadd.f32 %v1497_v29, %v3943_v50  ;;  %v3094_v24 = vpop.eup %3093  ;;  %v2000_v25 = vmul.f32 %v4309_v18, %v4278_v4  ;;  %3099 = vrcp.f32 %v4307_v17 }
 0x3f0   : > { %v1957_v57 = vmul.f32 %v3088_v15, %v1956_v21  ;;  %v1548_v45 = vpop.f32.mrf.mxu0  ;;  %v1977_v28 = vsel %vm4320_vm12, %v4276_v10, %v1973_v14  ;;  %v4333_v55 = vadd.f32 1.0, %v3094_v24  ;;  %vm2005_vm1 = vweird.f32 %v4309_v18 }
 0x3f1   : > { %2188 = vst [vmem:[%s4040_s29 + $0x40] sm:$0xff] %v2172_v11  ;;  %v2001_v31 = vsub.f32 1.0, %v2000_v25  ;;  %v3096_v32 = vpop.eup %3095  ;;  %v2700_v36 = vmul.f32 -1.442695, %v1498_v23  ;;  %v1549_v20 = vadd.f32 %v1548_v45, %v3935_v12  ;;  %v1982_v48 = vsel %vm4324_vm13, %v1981_v34, %v1977_v28 }
 0x3f2   : > { %v1958_v30 = vadd.f32 %v3088_v15, %v1957_v57  ;;  %3101 = vrcp.f32 %v4333_v55  ;;  %v4341_v0 = vadd.f32 1.0, %v3096_v32  ;;  %v1993_v46 = vand.u32 2147483647, %v4307_v17 }
 0x3f3   : > { %v2002_v58 = vmul.f32 %v4309_v18, %v2001_v31  ;;  %3103 = vpow2.f32 %v2700_v36  ;;  %v2703_v6 = vmul.f32 -1.442695, %v1549_v20  ;;  %v1995_v63 = vand.u32 2147483648, %v4307_v17 }
 0x3f4   : > { %v1962_v38 = vsel %vm1961_vm15, %v3088_v15, %v1958_v30  ;;  %v3098_v62 = vpop.eup %3097  ;;  %3105 = vrcp.f32 %v4341_v0  ;;  %vm2004_vm2 = vweird.f32 %v4278_v4  ;;  %vm4356_vm3 = vcmp.eq.f32.partialorder %v2008_v40, 8.507059e+37 }
 0x3f5   : > { %v1967_v61 = vsel %vm1964_vm0, %v1966_v35, %v1962_v38  ;;  %v4343_v41 = vadd.f32 1.0, %v3098_v62  ;;  %v3100_v2 = vpop.eup %3099  ;;  %v2003_v10 = vadd.f32 %v4309_v18, %v2002_v58  ;;  %vm4363_vm4 = vmor %vm2004_vm2, %vm2005_vm1  ;;  %v2011_v27 = vor.u32 1.1754944e-38, %v2010_v43 }
 0x3f6   : > { %v2173_v39 = vpack.c.bf16 %v1982_v48, %v1967_v61  ;;  %v1499_v42 = vpop.f32.mrf.mxu3  ;;  %v1985_v44 = vmul.f32 %v3100_v2, %v4307_v17  ;;  %vm1989_vm5 = vweird.f32 %v4307_v17  ;;  %v2038_v4 = vand.u32 2147483647, %v4333_v55 }
 0x3f7   : > { %3107 = vrcp.f32 %v4343_v41  ;;  %v2007_v51 = vsel %vm4363_vm4, %v4309_v18, %v2003_v10  ;;  %vm1990_vm6 = vweird.f32 %v3100_v2  ;;  %vm4374_vm7 = vcmp.eq.f32.partialorder %v1993_v46, 8.507059e+37 }
 0x3f8   : > { %2189 = vst [vmem:[%s4040_s29 + $0x48] sm:$0xff] %v2173_v39  ;;  %v4353_v26 = vpop.eup %3101  ;;  %v1986_v9 = vsub.f32 1.0, %v1985_v44  ;;  %3109 = vpow2.f32 %v2703_v6  ;;  %v1551_v15 = vpop.f32.mrf.mxu0  ;;  %v1996_v54 = vor.u32 1.1754944e-38, %v1995_v63  ;;  %v1500_v13 = vadd.f32 %v1499_v42, %v3943_v50  ;;  %vm1991_vm9 = vmor %vm1989_vm5, %vm1990_vm6 }
 0x3f9   : > { %v2030_v49 = vmul.f32 %v4353_v26, %v4333_v55  ;;  %v3104_v16 = vpop.eup %3103  ;;  %vm2034_vm8 = vweird.f32 %v4333_v55  ;;  %v2040_v3 = vand.u32 2147483648, %v4333_v55  ;;  %v2012_v7 = vsel %vm4356_vm3, %v2011_v27, %v2007_v51 }
 0x3fa   : > { %v1987_v22 = vmul.f32 %v3100_v2, %v1986_v9  ;;  %v3106_v59 = vpop.eup %3105  ;;  %v4381_v5 = vadd.f32 1.0, %v3104_v16  ;;  %vm2035_vm10 = vweird.f32 %v4353_v26  ;;  %vm4390_vm11 = vcmp.eq.f32.partialorder %v2038_v4, 8.507059e+37 }
 0x3fb   : > { %v2031_v56 = vsub.f32 1.0, %v2030_v49  ;;  %v2015_v21 = vmul.f32 %v3106_v59, %v4341_v0  ;;  %v2702_v19 = vmul.f32 -1.442695, %v1500_v13  ;;  %v1552_v17 = vadd.f32 %v1551_v15, %v3935_v12  ;;  %vm4413_vm13 = vmor %vm2034_vm8, %vm2035_vm10 }
 0x3fc   : > { %v1988_v1 = vadd.f32 %v3100_v2, %v1987_v22  ;;  %3111 = vrcp.f32 %v4381_v5  ;;  %v2041_v60 = vor.u32 1.1754944e-38, %v2040_v3  ;;  %v2023_v45 = vand.u32 2147483647, %v4341_v0 }
 0x3fd   : > { %v2032_v11 = vmul.f32 %v4353_v26, %v2031_v56  ;;  %v4395_v29 = vpop.eup %3107  ;;  %v2016_v24 = vsub.f32 1.0, %v2015_v21  ;;  %v2025_v28 = vand.u32 2147483648, %v4341_v0  ;;  %vm2020_vm12 = vweird.f32 %v3106_v59 }
 0x3fe   : > { %v1502_v8 = vpop.f32.mrf.mxu3  ;;  %v1992_v18 = vsel %vm1991_vm9, %v3100_v2, %v1988_v1  ;;  %v2060_v57 = vmul.f32 %v4395_v29, %v4343_v41  ;;  %v3110_v25 = vpop.eup %3109  ;;  %vm2019_vm14 = vweird.f32 %v4341_v0  ;;  %vm2064_vm15 = vweird.f32 %v4343_v41 }
 0x3ff   : > { %v1997_v33 = vsel %vm4374_vm7, %v1996_v54, %v1992_v18  ;;  %v2033_v23 = vadd.f32 %v4353_v26, %v2032_v11  ;;  %v2017_v30 = vmul.f32 %v3106_v59, %v2016_v24  ;;  %v4406_v32 = vadd.f32 1.0, %v3110_v25  ;;  %vm2021_vm0 = vmor %vm2019_vm14, %vm2020_vm12 }
 0x400   : > { %v2174_v53 = vpack.c.bf16 %v2012_v7, %v1997_v33  ;;  %v2061_v31 = vsub.f32 1.0, %v2060_v57  ;;  %3113 = vpow2.f32 %v2702_v19  ;;  %v2705_v35 = vmul.f32 -1.442695, %v1552_v17  ;;  %v1553_v61 = vpop.f32.mrf.mxu0 }
 0x401   : > { %v2037_v36 = vsel %vm4413_vm13, %v4353_v26, %v2033_v23  ;;  %v2018_v38 = vadd.f32 %v3106_v59, %v2017_v30  ;;  %3115 = vrcp.f32 %v4406_v32  ;;  %v2026_v20 = vor.u32 1.1754944e-38, %v2025_v28 }
 0x402   : > { %2190 = vst [vmem:[%s4040_s29 + $0x50] sm:$0xff] %v2174_v53  ;;  %v2062_v58 = vmul.f32 %v4395_v29, %v2061_v31  ;;  %v3112_v55 = vpop.eup %3111  ;;  %v2068_v62 = vand.u32 2147483647, %v4343_v41  ;;  %3117 = vpow2.f32 %v2705_v35  ;;  %v1503_v48 = vadd.f32 %v1502_v8, %v3943_v50 }
 0x403   : > { %v2022_v39 = vsel %vm2021_vm0, %v3106_v59, %v2018_v38  ;;  %vm2024_vm1 = vcmp.eq.f32.partialorder %v2023_v45, 8.507059e+37  ;;  %v2070_v40 = vand.u32 2147483648, %v4343_v41  ;;  %v2045_v0 = vmul.f32 %v3112_v55, %v4381_v5 }
 0x404   : > { %v2042_v2 = vsel %vm4390_vm11, %v2041_v60, %v2037_v36  ;;  %v2027_v43 = vsel %vm2024_vm1, %v2026_v20, %v2022_v39  ;;  %vm2065_vm2 = vweird.f32 %v4395_v29  ;;  %v2704_v10 = vmul.f32 -1.442695, %v1503_v48 }
 0x405   : > { %v2175_v44 = vpack.c.bf16 %v2042_v2, %v2027_v43  ;;  %v2063_v6 = vadd.f32 %v4395_v29, %v2062_v58  ;;  %v2046_v46 = vsub.f32 1.0, %v2045_v0  ;;  %v1554_v63 = vadd.f32 %v1553_v61, %v3935_v12  ;;  %vm4443_vm4 = vmor %vm2064_vm15, %vm2065_vm2 }
 0x406   : > { %v1504_v42 = vpop.f32.mrf.mxu3  ;;  %v3114_v26 = vpop.eup %3113  ;;  %v2053_v37 = vand.u32 2147483647, %v4381_v5  ;;  %v2055_v9 = vand.u32 2147483648, %v4381_v5  ;;  %3119 = vpow2.f32 %v2704_v10  ;;  %vm2050_vm3 = vweird.f32 %v3112_v55 }
 0x407   : > { %v1505_v47 = vadd.f32 %v1504_v42, %v3943_v50  ;;  %v4436_v27 = vpop.eup %3115  ;;  %2191 = vst [vmem:[%s4040_s29 + $0x58] sm:$0xff] %v2175_v44  ;;  %v2047_v49 = vmul.f32 %v3112_v55, %v2046_v46  ;;  %v1678_v4 = vadd.f32 1.0, %v3114_v26  ;;  %v2707_v51 = vmul.f32 -1.442695, %v1554_v63 }
 0x408   : > { %v3118_v22 = vpop.eup %3117  ;;  %v2071_v15 = vor.u32 1.1754944e-38, %v2070_v40  ;;  %v2090_v50 = vmul.f32 %v4436_v27, %v4406_v32  ;;  %v2067_v52 = vsel %vm4443_vm4, %v4395_v29, %v2063_v6  ;;  %vm2049_vm5 = vweird.f32 %v4381_v5 }
 0x409   : > { %v2706_v16 = vmul.f32 -1.442695, %v1505_v47  ;;  %v2048_v54 = vadd.f32 %v3112_v55, %v2047_v49  ;;  %3121 = vrcp.f32 %v1678_v4  ;;  %vm2051_vm6 = vmor %vm2049_vm5, %vm2050_vm3  ;;  %v2056_v56 = vor.u32 1.1754944e-38, %v2055_v9 }
 0x40a   : > { %v2091_v41 = vsub.f32 1.0, %v2090_v50  ;;  %v4453_v13 = vadd.f32 1.0, %v3118_v22  ;;  %3123 = vpow2.f32 %v2707_v51  ;;  %vm2069_vm7 = vcmp.eq.f32.partialorder %v2068_v62, 8.507059e+37 }
 0x40b   : > { %v2052_v59 = vsel %vm2051_vm6, %v3112_v55, %v2048_v54  ;;  %vm2054_vm8 = vcmp.eq.f32.partialorder %v2053_v37, 8.507059e+37  ;;  %3125 = vpow2.f32 %v2706_v16  ;;  %v2072_v3 = vsel %vm2069_vm7, %v2071_v15, %v2067_v52 }
 0x40c   : > { %v3120_v1 = vpop.eup %3119  ;;  %v2057_v8 = vsel %vm2054_vm8, %v2056_v56, %v2052_v59  ;;  %3127 = vrcp.f32 %v4453_v13  ;;  %v2092_v5 = vmul.f32 %v4436_v27, %v2091_v41  ;;  %v2098_v29 = vand.u32 2147483647, %v4406_v32 }
 0x40d   : > { %v2176_v7 = vpack.c.bf16 %v2072_v3, %v2057_v8  ;;  %v4457_v11 = vadd.f32 1.0, %v3120_v1  ;;  %vm2095_vm9 = vweird.f32 %v4436_v27  ;;  %v2100_v33 = vand.u32 2147483648, %v4406_v32 }
 0x40e   : > { %v2093_v17 = vadd.f32 %v4436_v27, %v2092_v5  ;;  %v2083_v23 = vand.u32 2147483647, %v1678_v4  ;;  %v2085_v25 = vand.u32 2147483648, %v1678_v4  ;;  %vm2094_vm10 = vweird.f32 %v4406_v32 }
 0x40f   : > { %v3122_v14 = vpop.eup %3121  ;;  %2192 = vst [vmem:[%s4040_s29 + $0x60] sm:$0xff] %v2176_v7  ;;  %3129 = vrcp.f32 %v4457_v11  ;;  %vm4474_vm11 = vmor %vm2094_vm10, %vm2095_vm9  ;;  %vm4478_vm12 = vcmp.eq.f32.partialorder %v2098_v29, 8.507059e+37  ;;  %v2101_v32 = vor.u32 1.1754944e-38, %v2100_v33  ;;  %vm2079_vm14 = vweird.f32 %v1678_v4 }
 0x410   : > { %v3124_v21 = vpop.eup %3123  ;;  %v2075_v18 = vmul.f32 %v3122_v14, %v1678_v4  ;;  %vm2080_vm13 = vweird.f32 %v3122_v14  ;;  %v2097_v34 = vsel %vm4474_vm11, %v4436_v27, %v2093_v17  ;;  %vm2084_vm15 = vcmp.eq.f32.partialorder %v2083_v23, 8.507059e+37 }
 0x411   : > { %v3126_v19 = vpop.eup %3125  ;;  %v4467_v53 = vadd.f32 1.0, %v3124_v21  ;;  %v2086_v58 = vor.u32 1.1754944e-38, %v2085_v25  ;;  %vm2081_vm0 = vmor %vm2079_vm14, %vm2080_vm13  ;;  %v2128_v20 = vand.u32 2147483647, %v4453_v13  ;;  %v2130_v62 = vand.u32 2147483648, %v4453_v13 }
 0x412   : > { %v4465_v24 = vpop.eup %3127  ;;  %v2076_v57 = vsub.f32 1.0, %v2075_v18  ;;  %v4469_v60 = vadd.f32 1.0, %v3126_v19  ;;  %v2102_v61 = vsel %vm4478_vm12, %v2101_v32, %v2097_v34  ;;  %v2113_v40 = vand.u32 2147483647, %v4457_v11 }
 0x413   : > { %v2120_v45 = vmul.f32 %v4465_v24, %v4453_v13  ;;  %3131 = vrcp.f32 %v4467_v53  ;;  %v2115_v0 = vand.u32 2147483648, %v4457_v11  ;;  %vm2125_vm1 = vweird.f32 %v4465_v24 }
 0x414   : > { %v2077_v31 = vmul.f32 %v3122_v14, %v2076_v57  ;;  %3133 = vrcp.f32 %v4469_v60  ;;  %vm2124_vm2 = vweird.f32 %v4453_v13  ;;  %vm4498_vm3 = vcmp.eq.f32.partialorder %v2128_v20, 8.507059e+37 }
 0x415   : > { %v2121_v35 = vsub.f32 1.0, %v2120_v45  ;;  %v3130_v36 = vpop.eup %3129  ;;  %vm4504_vm5 = vmor %vm2124_vm2, %vm2125_vm1  ;;  %v2131_v9 = vor.u32 1.1754944e-38, %v2130_v62  ;;  %vm2109_vm6 = vweird.f32 %v4457_v11  ;;  %vm4509_vm7 = vcmp.eq.f32.partialorder %v2113_v40, 8.507059e+37 }
 0x416   : > { %v2078_v38 = vadd.f32 %v3122_v14, %v2077_v31  ;;  %v2105_v48 = vmul.f32 %v3130_v36, %v4457_v11  ;;  %vm2110_vm4 = vweird.f32 %v3130_v36  ;;  %v2116_v51 = vor.u32 1.1754944e-38, %v2115_v0 }
 0x417   : > { %v2122_v55 = vmul.f32 %v4465_v24, %v2121_v35  ;;  %vm2111_vm8 = vmor %vm2109_vm6, %vm2110_vm4  ;;  %v2158_v12 = vand.u32 2147483647, %v4467_v53  ;;  %v2160_v15 = vand.u32 2147483648, %v4467_v53  ;;  %v2143_v16 = vand.u32 2147483647, %v4469_v60 }
 0x418   : > { %v2082_v39 = vsel %vm2081_vm0, %v3122_v14, %v2078_v38  ;;  %v2106_v43 = vsub.f32 1.0, %v2105_v48  ;;  %v2145_v56 = vand.u32 2147483648, %v4469_v60  ;;  %vm2154_vm11 = vweird.f32 %v4467_v53 }
 0x419   : > { %v2087_v42 = vsel %vm2084_vm15, %v2086_v58, %v2082_v39  ;;  %v2123_v2 = vadd.f32 %v4465_v24, %v2122_v55  ;;  %v3132_v10 = vpop.eup %3131  ;;  %vm2139_vm13 = vweird.f32 %v4469_v60  ;;  %v2161_v5 = vor.u32 1.1754944e-38, %v2160_v15 }
 0x41a   : > { %v2177_v44 = vpack.c.bf16 %v2102_v61, %v2087_v42  ;;  %v3134_v6 = vpop.eup %3133  ;;  %v2107_v63 = vmul.f32 %v3130_v36, %v2106_v43  ;;  %v2150_v26 = vmul.f32 %v3132_v10, %v4467_v53  ;;  %vm2155_vm9 = vweird.f32 %v3132_v10 }
 0x41b   : > { %v2135_v27 = vmul.f32 %v3134_v6, %v4469_v60  ;;  %v2127_v49 = vsel %vm4504_vm5, %v4465_v24, %v2123_v2  ;;  %vm2140_vm10 = vweird.f32 %v3134_v6  ;;  %vm2156_vm12 = vmor %vm2154_vm11, %vm2155_vm9  ;;  %v2146_v11 = vor.u32 1.1754944e-38, %v2145_v56 }
 0x41c   : > { %2193 = vst [vmem:[%s4040_s29 + $0x68] sm:$0xff] %v2177_v44  ;;  %v2108_v4 = vadd.f32 %v3130_v36, %v2107_v63  ;;  %v2151_v22 = vsub.f32 1.0, %v2150_v26  ;;  %v2132_v41 = vsel %vm4498_vm3, %v2131_v9, %v2127_v49  ;;  %vm2141_vm14 = vmor %vm2139_vm13, %vm2140_vm10  ;;  %vm2159_vm15 = vcmp.eq.f32.partialorder %v2158_v12, 8.507059e+37 }
 0x41d   : > { %v2136_v50 = vsub.f32 1.0, %v2135_v27  ;;  %vm2144_vm0 = vcmp.eq.f32.partialorder %v2143_v16, 8.507059e+37 }
 0x41e   : > { %v2112_v52 = vsel %vm2111_vm8, %v3130_v36, %v2108_v4  ;;  %v2152_v54 = vmul.f32 %v3132_v10, %v2151_v22 }
 0x41f   : > { %v2117_v13 = vsel %vm4509_vm7, %v2116_v51, %v2112_v52  ;;  %v2137_v59 = vmul.f32 %v3134_v6, %v2136_v50 }
 0x420   : > { %v2178_v1 = vpack.c.bf16 %v2132_v41, %v2117_v13  ;;  %v2153_v3 = vadd.f32 %v3132_v10, %v2152_v54 }
 0x421   : > { %v2138_v8 = vadd.f32 %v3134_v6, %v2137_v59 }
 0x422   : > { %2194 = vst [vmem:[%s4040_s29 + $0x70] sm:$0xff] %v2178_v1  ;;  %v2157_v7 = vsel %vm2156_vm12, %v3132_v10, %v2153_v3 }
 0x423   : > { %v2142_v14 = vsel %vm2141_vm14, %v3134_v6, %v2138_v8  ;;  %v2162_v21 = vsel %vm2159_vm15, %v2161_v5, %v2157_v7 }
 0x424   : > { %v2147_v29 = vsel %vm2144_vm0, %v2146_v11, %v2142_v14 }
 0x425   : > { %v2179_v18 = vpack.c.bf16 %v2162_v21, %v2147_v29 }
 0x427   : > { %2195 = vst [vmem:[%s4040_s29 + $0x78] sm:$0xff] %v2179_v18 }
 0x428   : > { %3340 = shalt.err (!%p3337_p8)
}
 0x429   : > { %2851 = dma.vmem_to_hbm [thread:$0]  (%p3554_p5), %s2232_s21, 2048, %s2234_s26, %s2213_s8, %s3402_s5, %s3402_s5, %s3403_s28  }
 0x42a PF: > { %s2265_s6 = sand.u32 1, %s3379_s17   ;;  %p4654_p9 = scmp.ge.s32.totalorder %s3391_s20, 2 }
 0x42b   : > { %s2266_s29 = scalar_lea.sflag [#allocation4], %s2265_s6 }
 0x42c   : > { %p2873_p10 = pnand %p4654_p9, %p3499_p6 }
 0x42e   : > { %p2874_p2 = pneg %p2873_p10 }
 0x430   : > { %3370 = dma.done.wait (%p2874_p2), %s2266_s29, 2048  }
 0x431   : > { %3372 = vsyncadd (%p2874_p2), %s2266_s29, 4294965248  ;;  %s2276_s25 = scalar_lea.sflag [#allocation13], %s2265_s6 }
 0x432   : > { %3374 = dma.done.wait (%p2874_p2), %s2276_s25, 2048  }
 0x433   : > { %3376 = vsyncadd (%p2874_p2), %s2276_s25, 4294965248  ;;  %s4655_s16 = sld [smem:[#allocation19_spill]]  ;;  %p30_p5 = scmp.ge.s32.totalorder %s3541_s3, 4  }
 0x434   : > { %s4656_s17 = smov %s3383_s18  ;;  %s4657_s18 = smov %s3387_s19 }
 0x435   : > { %s4659_s20 = smov %s3541_s3  ;;  %32 = sbr.rel (!%p30_p5) target bundleno = 14 (0xe), region = 141 }
 0x439   : > { %s4658_s19 = smov %s4655_s16 }
 0x43a   :  { %2282 = vsyncpa [#allocation3], 1 }
 0x43b   :  { %2284 = vsyncpa [#allocation3 + $0x1], 1 }
 0x43c   :  { %2285 = vsyncpa [#allocation6], 1 }
 0x43d   :  { %2286 = vsyncpa [#allocation9], 1 }
 0x43e   :  { %2287 = vsyncpa [#allocation4], 1 }
 0x43f   :  { %2289 = vsyncpa [#allocation4 + $0x1], 1 }
 0x440   :  { %2290 = vsyncpa [#allocation13], 1 }
 0x441   :  { %2292 = vsyncpa [#allocation13 + $0x1], 1 }

</bundles_post_ra>
